<compile_context>
chip_gen: v5e
topology: v5e:2x2
jax: 0.10.0
libtpu: 0.0.40
codegen_flags: <defaults>
</compile_context>

<pallas_src>
import functools
import math

import jax
import jax.numpy as jnp
from jax import lax
from jax.experimental import pallas as pl
from jax.experimental.pallas import tpu as pltpu

_INV_LN2 = 1.0 / math.log(2.0)


def _pick_c_tile(C, HW, itemsize=4, budget=6 << 20):
    """Largest channel tile that (a) divides C, (b) is a multiple of 8
    (sublane constraint), (c) keeps one (TC, H*W) block under `budget` bytes."""
    max_tc = max(8, budget // (HW * itemsize))
    for t in (512, 256, 128, 64, 32, 16, 8):
        if t <= max_tc and C % t == 0:
            return t
    return C  # small / odd C: whole axis (block dim == full dim is always legal)


def _params(semantics, block_bytes, scratch_bytes=0):
    """CompilerParams with a VMEM budget derived from the block sizes (2x for
    double-buffering) — avoids the 16 MiB (v5e) / 32 MiB (v6e,v7x) default
    scoped-VMEM ceiling at non-toy shapes."""
    vmem = 2 * int(sum(block_bytes)) + int(scratch_bytes) + (2 << 20)
    vmem = max(16 << 20, min(vmem, 100 << 20))
    return pltpu.CompilerParams(dimension_semantics=semantics,
                                vmem_limit_bytes=vmem)


# ----------------------------------------------------------------------------
# Pass A: per-channel softmax entropy over H*W (lane-dense).
# ----------------------------------------------------------------------------
def _chan_entropy_kernel(x_ref, ent_ref):
    # ent = (1/ln2) * (log(s) - sum(e*(x-m))/s),  e = exp(x-m), s = sum(e)
    # -> never materializes p or log(p); exp is the only full-tile transcendental.
    x = x_ref[0].astype(jnp.float32)                    # (TC, HW)
    m = jnp.max(x, axis=1, keepdims=True)               # (TC, 1)
    xm = x - m
    e = jnp.exp(xm)
    s = jnp.sum(e, axis=1, keepdims=True)               # (TC, 1)
    t = jnp.sum(e * xm, axis=1, keepdims=True)          # (TC, 1)
    ent_ref[0] = _INV_LN2 * (jnp.log(s) - t / s)        # (TC, 1)


# ----------------------------------------------------------------------------
# Pass B: spatial entropy of y = x * channel_att, accumulated over C tiles.
# ----------------------------------------------------------------------------
def _spatial_entropy_kernel(x_ref, att_ref, ent2_ref):
    c = pl.program_id(1)

    @pl.when(c == 0)
    def _():
        ent2_ref[...] = jnp.zeros_like(ent2_ref)

    x = x_ref[0].astype(jnp.float32)                    # (TC, H, W)
    y = x * att_ref[0]                                  # (TC, 1, 1) broadcast
    # softmax over W per (c, h) row; entropy summed over this C tile:
    #   -sum_c p*log2(p) = (1/ln2) * sum_c (e2/s2) * (log(s2) - (y - m2))
    m2 = jnp.max(y, axis=2, keepdims=True)              # (TC, H, 1)
    ym = y - m2
    e2 = jnp.exp(ym)                                    # (TC, H, W)
    s2 = jnp.sum(e2, axis=2, keepdims=True)             # (TC, H, 1)
    inv_s2 = 1.0 / s2                                   # small (TC, H, 1) divide
    log_s2 = jnp.log(s2)                                # small (TC, H, 1) log
    ent2_ref[0] += _INV_LN2 * jnp.sum((e2 * inv_s2) * (log_s2 - ym), axis=0)


# ----------------------------------------------------------------------------
# Pass C: 7x7 "same" conv + sigmoid on the pre-normalized, pre-padded map.
# ----------------------------------------------------------------------------
def _spatial_conv_kernel(enp_ref, cp_ref, satt_ref, *, H, W):
    enp = enp_ref[0]                                    # (H+6, W+6), already padded
    # Hoist the 7 column (lane) shifts out of the ky loop: 7 lane shifts total,
    # then the 49-tap loop only does sublane-offset reads + FMA (VALU).
    cols = [enp[:, kx:kx + W] for kx in range(7)]       # each (H+6, W)
    acc = jnp.zeros((H, W), jnp.float32)
    for ky in range(7):
        for kx in range(7):
            acc = acc + cp_ref[ky * 7 + kx] * cols[kx][ky:ky + H, :]
    satt_ref[0] = jax.nn.sigmoid(acc + cp_ref[49])      # (H, W)


# ----------------------------------------------------------------------------
# Pass D: out = x * channel_att * spatial_att (lane-dense).
# ----------------------------------------------------------------------------
def _rescale_kernel(x_ref, att_ref, satt_ref, o_ref):
    x = x_ref[0].astype(jnp.float32)                    # (TC, HW)
    o_ref[0] = (x * att_ref[0] * satt_ref[0]).astype(o_ref.dtype)


# ----------------------------------------------------------------------------
# Wrapper.
# ----------------------------------------------------------------------------
@jax.jit
def ebam(x, w1, b1, w2, b2, conv_w, conv_b):
    B, C, H, W = x.shape
    HW = H * W
    itemsize = jnp.dtype(x.dtype).itemsize
    TC = _pick_c_tile(C, HW, itemsize)
    n_ct = C // TC
    f32 = jnp.float32

    x2d = x.reshape(B, C, HW)   # free contiguous reshape -> lane-dense view

    # ---- Pass A: channel entropies ------------------------------------------
    ent = pl.pallas_call(
        _chan_entropy_kernel,
        out_shape=jax.ShapeDtypeStruct((B, C, 1), f32),
        grid=(B, n_ct),
        in_specs=[pl.BlockSpec((1, TC, HW), lambda b, c: (b, c, 0))],
        out_specs=pl.BlockSpec((1, TC, 1), lambda b, c: (b, c, 0)),
        compiler_params=_params(("parallel", "parallel"),
                                [TC * HW * itemsize, TC * 4]),
    )(x2d)

    # ---- tiny MLP + sigmoid in plain XLA (microscopic (B,C)@(C,Ch) matvec) --
    ent_bc = ent[:, :, 0]
    h = ent_bc @ w1.astype(f32) + b1.astype(f32)
    att = jax.nn.sigmoid(h @ w2.astype(f32) + b2.astype(f32))        # (B, C)

    # ---- Pass B: spatial entropy map, accumulated over C tiles --------------
    ent2 = pl.pallas_call(
        _spatial_entropy_kernel,
        out_shape=jax.ShapeDtypeStruct((B, H, W), f32),
        grid=(B, n_ct),
        in_specs=[
            pl.BlockSpec((1, TC, H, W), lambda b, c: (b, c, 0, 0)),
            pl.BlockSpec((1, TC, 1, 1), lambda b, c: (b, c, 0, 0)),
        ],
        out_specs=pl.BlockSpec((1, H, W), lambda b, c: (b, 0, 0)),
        compiler_params=_params(("parallel", "arbitrary"),
                                [TC * H * W * itemsize, TC * 4, HW * 4]),
    )(x, att.reshape(B, C, 1, 1))

    # ---- global max spans batches: tiny XLA reduce + normalize + pad once ---
    inv_gmax = 1.0 / jnp.max(ent2)
    enp = jnp.pad(1.0 - ent2 * inv_gmax, ((0, 0), (3, 3), (3, 3)))   # (B,H+6,W+6)

    # Conv params flattened to 1-D for SMEM (avoids 2-D SMEM padding): 49 taps + bias.
    conv_p = jnp.concatenate([conv_w.astype(f32).reshape(49),
                              conv_b.astype(f32).reshape(1)])        # (50,)

    # ---- Pass C: 7x7 conv + sigmoid -> spatial attention ---------------------
    satt = pl.pallas_call(
        functools.partial(_spatial_conv_kernel, H=H, W=W),
        out_shape=jax.ShapeDtypeStruct((B, H, W), f32),
        grid=(B,),
        in_specs=[
            pl.BlockSpec((1, H + 6, W + 6), lambda b: (b, 0, 0)),
            pl.BlockSpec(memory_space=pltpu.MemorySpace.SMEM),
        ],
        out_specs=pl.BlockSpec((1, H, W), lambda b: (b, 0, 0)),
        compiler_params=_params(("parallel",),
                                [(H + 6) * (W + 6) * 4, HW * 4]),
    )(enp, conv_p)

    # ---- Pass D: final rescale, fully lane-dense -----------------------------
    out2d = pl.pallas_call(
        _rescale_kernel,
        out_shape=jax.ShapeDtypeStruct((B, C, HW), x.dtype),
        grid=(B, n_ct),
        in_specs=[
            pl.BlockSpec((1, TC, HW), lambda b, c: (b, c, 0)),
            pl.BlockSpec((1, TC, 1), lambda b, c: (b, c, 0)),
            pl.BlockSpec((1, 1, HW), lambda b, c: (b, 0, 0)),
        ],
        out_specs=pl.BlockSpec((1, TC, HW), lambda b, c: (b, c, 0)),
        compiler_params=_params(("parallel", "parallel"),
                                [TC * HW * itemsize, TC * 4, HW * 4,
                                 TC * HW * itemsize]),
    )(x2d, att.reshape(B, C, 1), satt.reshape(B, 1, HW))

    return out2d.reshape(B, C, H, W)


# ----------------------------------------------------------------------------
# Pure-JAX reference (mirrors the PyTorch forward) for verification.
# ----------------------------------------------------------------------------
def ebam_reference(x, w1, b1, w2, b2, conv_w, conv_b):
    B, C, H, W = x.shape
    xf = x.reshape(B, C, H * W)
    p = jax.nn.softmax(xf, axis=-1)
    ent = -jnp.sum(p * jnp.log2(p), axis=-1)             # (B, C)
    att = jax.nn.sigmoid((ent @ w1 + b1) @ w2 + b2)[:, :, None, None]
    y = x * att

    ps = jax.nn.softmax(y, axis=-1)
    ent2 = -jnp.sum(ps * jnp.log2(ps), axis=1, keepdims=True)  # (B,1,H,W)
    ent2 = 1.0 - ent2 / jnp.max(ent2)
    conv = lax.conv_general_dilated(
        ent2, conv_w[None, None], (1, 1), ((3, 3), (3, 3)),
        dimension_numbers=("NCHW", "OIHW", "NCHW"))
    satt = jax.nn.sigmoid(conv + conv_b)
    return y * satt


if __name__ == "__main__":
    key = jax.random.PRNGKey(0)
    B, C, H, W = 2, 8, 16, 16
    reduction_ratio = 2
    Ch = C // reduction_ratio

    ks = jax.random.split(key, 7)
    x = jax.random.normal(ks[0], (B, C, H, W), jnp.float32)
    # Linear weights stored as (in, out).
    w1 = jax.random.normal(ks[1], (C, Ch), jnp.float32) * 0.3
    b1 = jax.random.normal(ks[2], (Ch,), jnp.float32) * 0.1
    w2 = jax.random.normal(ks[3], (Ch, C), jnp.float32) * 0.3
    b2 = jax.random.normal(ks[4], (C,), jnp.float32) * 0.1
    conv_w = jax.random.normal(ks[5], (7, 7), jnp.float32) * 0.1
    conv_b = jax.random.normal(ks[6], (), jnp.float32) * 0.1

    out = ebam(x, w1, b1, w2, b2, conv_w, conv_b)
    out = jax.block_until_ready(out)

    ref = ebam_reference(x, w1, b1, w2, b2, conv_w, conv_b)
    assert out.shape == x.shape and out.dtype == x.dtype
    assert jnp.allclose(out, ref, atol=1e-4, rtol=1e-4), float(
        jnp.max(jnp.abs(out - ref)))
    print("KERNEL_OK")
</pallas_src>

<mosaic_0001>
module attributes {stable_mosaic.version = 11 : i64} {
  func.func @_chan_entropy_kernel(%arg0: i32, %arg1: i32, %arg2: memref<1x8x256xf32, #tpu.memory_space<vmem>>, %arg3: memref<1x8x1xf32, #tpu.memory_space<vmem>>) attributes {dimension_semantics = [#tpu.dimension_semantics<parallel>, #tpu.dimension_semantics<parallel>], iteration_bounds = array<i64: 2, 1>, scalar_prefetch = 0 : i64, scratch_operands = 0 : i64, tpu.core_type = #tpu.core_type<tc>, window_params = [{transform_indices = @transform_0, window_bounds = array<i64: 1, 8, 256>}, {transform_indices = @transform_1, window_bounds = array<i64: 1, 8, 1>}]} {
    %c0 = arith.constant 0 : index
    %c0_0 = arith.constant 0 : index
    %c0_1 = arith.constant 0 : index
    %0 = vector.load %arg2[%c0, %c0_0, %c0_1] : memref<1x8x256xf32, #tpu.memory_space<vmem>>, vector<1x8x256xf32>
    %1 = vector.shape_cast %0 : vector<1x8x256xf32> to vector<8x256xf32>
    %cst = arith.constant dense<0xFF800000> : vector<8xf32>
    %2 = vector.multi_reduction <maximumf>, %1, %cst [1] : vector<8x256xf32> to vector<8xf32>
    %3 = vector.shape_cast %2 : vector<8xf32> to vector<8x1xf32>
    %4 = vector.broadcast %3 : vector<8x1xf32> to vector<8x256xf32>
    %5 = arith.subf %1, %4 : vector<8x256xf32>
    %6 = math.exp %5 : vector<8x256xf32>
    %cst_2 = arith.constant dense<0.000000e+00> : vector<8xf32>
    %7 = vector.multi_reduction <add>, %6, %cst_2 [1] : vector<8x256xf32> to vector<8xf32>
    %8 = vector.shape_cast %7 : vector<8xf32> to vector<8x1xf32>
    %9 = arith.mulf %6, %5 : vector<8x256xf32>
    %cst_3 = arith.constant dense<0.000000e+00> : vector<8xf32>
    %10 = vector.multi_reduction <add>, %9, %cst_3 [1] : vector<8x256xf32> to vector<8xf32>
    %11 = vector.shape_cast %10 : vector<8xf32> to vector<8x1xf32>
    %12 = math.log %8 : vector<8x1xf32>
    %13 = arith.divf %11, %8 : vector<8x1xf32>
    %14 = arith.subf %12, %13 : vector<8x1xf32>
    %cst_4 = arith.constant 1.44269502 : f32
    %15 = vector.broadcast %cst_4 : f32 to vector<8x1xf32>
    %16 = arith.mulf %15, %14 : vector<8x1xf32>
    %c0_5 = arith.constant 0 : index
    %c0_6 = arith.constant 0 : index
    %c0_7 = arith.constant 0 : index
    %17 = vector.load %arg3[%c0_5, %c0_6, %c0_7] : memref<1x8x1xf32, #tpu.memory_space<vmem>>, vector<1x8x1xf32>
    %18 = vector.shape_cast %17 : vector<1x8x1xf32> to vector<8x1xf32>
    %19 = vector.shape_cast %16 : vector<8x1xf32> to vector<1x8x1xf32>
    tpu.vector_store %arg3[%c0_5, %c0_6, %c0_7], %19 {strides = array<i32>} : memref<1x8x1xf32, #tpu.memory_space<vmem>>, vector<1x8x1xf32>,
    return
  }
  func.func @transform_0(%arg0: i32, %arg1: i32) -> (i32, i32, i32) {
    %c0_i32 = arith.constant 0 : i32
    %c0_i32_0 = arith.constant 0 : i32
    return %arg0, %arg1, %c0_i32 : i32, i32, i32
  }
  func.func @transform_1(%arg0: i32, %arg1: i32) -> (i32, i32, i32) {
    %c0_i32 = arith.constant 0 : i32
    %c0_i32_0 = arith.constant 0 : i32
    return %arg0, %arg1, %c0_i32 : i32, i32, i32
  }
}

module attributes {stable_mosaic.version = 11 : i64} {
  func.func @_spatial_entropy_kernel(%arg0: i32, %arg1: i32, %arg2: memref<1x8x16x16xf32, #tpu.memory_space<vmem>>, %arg3: memref<1x8x1x1xf32, #tpu.memory_space<vmem>>, %arg4: memref<1x16x16xf32, #tpu.memory_space<vmem>>) attributes {dimension_semantics = [#tpu.dimension_semantics<parallel>, #tpu.dimension_semantics<arbitrary>], iteration_bounds = array<i64: 2, 1>, scalar_prefetch = 0 : i64, scratch_operands = 0 : i64, tpu.core_type = #tpu.core_type<tc>, window_params = [{transform_indices = @transform_0, window_bounds = array<i64: 1, 8, 16, 16>}, {transform_indices = @transform_1, window_bounds = array<i64: 1, 8, 1, 1>}, {transform_indices = @transform_2, window_bounds = array<i64: 1, 16, 16>}]} {
    %c0_i32 = arith.constant 0 : i32
    %0 = arith.cmpi eq, %arg1, %c0_i32 : i32
    %1 = arith.extui %0 : i1 to i32
    %c0_i32_0 = arith.constant 0 : i32
    %2 = arith.cmpi ne, %1, %c0_i32_0 : i32
    scf.if %2 {
      %cst_18 = arith.constant 0.000000e+00 : f32
      %33 = vector.broadcast %cst_18 : f32 to vector<1x16x16xf32>
      %c0_19 = arith.constant 0 : index
      %c0_20 = arith.constant 0 : index
      %c0_21 = arith.constant 0 : index
      %34 = vector.load %arg4[%c0_19, %c0_20, %c0_21] : memref<1x16x16xf32, #tpu.memory_space<vmem>>, vector<1x16x16xf32>
      tpu.vector_store %arg4[%c0_19, %c0_20, %c0_21], %33 {strides = array<i32>} : memref<1x16x16xf32, #tpu.memory_space<vmem>>, vector<1x16x16xf32>,
    } else {
    }
    %c0 = arith.constant 0 : index
    %c0_1 = arith.constant 0 : index
    %c0_2 = arith.constant 0 : index
    %c0_3 = arith.constant 0 : index
    %3 = vector.load %arg2[%c0, %c0_1, %c0_2, %c0_3] : memref<1x8x16x16xf32, #tpu.memory_space<vmem>>, vector<1x8x16x16xf32>
    %4 = vector.shape_cast %3 : vector<1x8x16x16xf32> to vector<8x16x16xf32>
    %c0_4 = arith.constant 0 : index
    %c0_5 = arith.constant 0 : index
    %c0_6 = arith.constant 0 : index
    %c0_7 = arith.constant 0 : index
    %5 = vector.load %arg3[%c0_4, %c0_5, %c0_6, %c0_7] : memref<1x8x1x1xf32, #tpu.memory_space<vmem>>, vector<1x8x1x1xf32>
    %6 = vector.shape_cast %5 : vector<1x8x1x1xf32> to vector<8x1x1xf32>
    %7 = vector.broadcast %6 : vector<8x1x1xf32> to vector<8x16x16xf32>
    %8 = arith.mulf %4, %7 : vector<8x16x16xf32>
    %cst = arith.constant dense<0xFF800000> : vector<8x16xf32>
    %9 = vector.multi_reduction <maximumf>, %8, %cst [2] : vector<8x16x16xf32> to vector<8x16xf32>
    %10 = vector.shape_cast %9 : vector<8x16xf32> to vector<8x16x1xf32>
    %11 = vector.broadcast %10 : vector<8x16x1xf32> to vector<8x16x16xf32>
    %12 = arith.subf %8, %11 : vector<8x16x16xf32>
    %13 = math.exp %12 : vector<8x16x16xf32>
    %cst_8 = arith.constant dense<0.000000e+00> : vector<8x16xf32>
    %14 = vector.multi_reduction <add>, %13, %cst_8 [2] : vector<8x16x16xf32> to vector<8x16xf32>
    %15 = vector.shape_cast %14 : vector<8x16xf32> to vector<8x16x1xf32>
    %cst_9 = arith.constant 1.000000e+00 : f32
    %16 = vector.broadcast %cst_9 : f32 to vector<8x16x1xf32>
    %17 = arith.divf %16, %15 : vector<8x16x1xf32>
    %18 = math.log %15 : vector<8x16x1xf32>
    %c0_10 = arith.constant 0 : index
    %c0_11 = arith.constant 0 : index
    %c0_12 = arith.constant 0 : index
    %19 = vector.load %arg4[%c0_10, %c0_11, %c0_12] : memref<1x16x16xf32, #tpu.memory_space<vmem>>, vector<1x16x16xf32>
    %20 = vector.shape_cast %19 : vector<1x16x16xf32> to vector<16x16xf32>
    %21 = vector.broadcast %17 : vector<8x16x1xf32> to vector<8x16x16xf32>
    %22 = arith.mulf %13, %21 : vector<8x16x16xf32>
    %23 = vector.broadcast %18 : vector<8x16x1xf32> to vector<8x16x16xf32>
    %24 = arith.subf %23, %12 : vector<8x16x16xf32>
    %25 = arith.mulf %22, %24 : vector<8x16x16xf32>
    %cst_13 = arith.constant dense<0.000000e+00> : vector<16x16xf32>
    %26 = vector.multi_reduction <add>, %25, %cst_13 [0] : vector<8x16x16xf32> to vector<16x16xf32>
    %cst_14 = arith.constant 1.44269502 : f32
    %27 = vector.broadcast %cst_14 : f32 to vector<16x16xf32>
    %28 = arith.mulf %27, %26 : vector<16x16xf32>
    %29 = arith.addf %20, %28 : vector<16x16xf32>
    %c0_15 = arith.constant 0 : index
    %c0_16 = arith.constant 0 : index
    %c0_17 = arith.constant 0 : index
    %30 = vector.load %arg4[%c0_15, %c0_16, %c0_17] : memref<1x16x16xf32, #tpu.memory_space<vmem>>, vector<1x16x16xf32>
    %31 = vector.shape_cast %30 : vector<1x16x16xf32> to vector<16x16xf32>
    %32 = vector.shape_cast %29 : vector<16x16xf32> to vector<1x16x16xf32>
    tpu.vector_store %arg4[%c0_15, %c0_16, %c0_17], %32 {strides = array<i32>} : memref<1x16x16xf32, #tpu.memory_space<vmem>>, vector<1x16x16xf32>,
    return
  }
  func.func @transform_0(%arg0: i32, %arg1: i32) -> (i32, i32, i32, i32) {
    %c0_i32 = arith.constant 0 : i32
    %c0_i32_0 = arith.constant 0 : i32
    %c0_i32_1 = arith.constant 0 : i32
    return %arg0, %arg1, %c0_i32, %c0_i32_0 : i32, i32, i32, i32
  }
  func.func @transform_1(%arg0: i32, %arg1: i32) -> (i32, i32, i32, i32) {
    %c0_i32 = arith.constant 0 : i32
    %c0_i32_0 = arith.constant 0 : i32
    %c0_i32_1 = arith.constant 0 : i32
    return %arg0, %arg1, %c0_i32, %c0_i32_0 : i32, i32, i32, i32
  }
  func.func @transform_2(%arg0: i32, %arg1: i32) -> (i32, i32, i32) {
    %c0_i32 = arith.constant 0 : i32
    %c0_i32_0 = arith.constant 0 : i32
    %c0_i32_1 = arith.constant 0 : i32
    return %arg0, %c0_i32, %c0_i32_0 : i32, i32, i32
  }
}

module attributes {stable_mosaic.version = 11 : i64} {
  func.func @_spatial_conv_kernel(%arg0: i32, %arg1: memref<1x22x22xf32, #tpu.memory_space<vmem>>, %arg2: memref<50xf32, #tpu.memory_space<smem>>, %arg3: memref<1x16x16xf32, #tpu.memory_space<vmem>>) attributes {dimension_semantics = [#tpu.dimension_semantics<parallel>], iteration_bounds = array<i64: 2>, scalar_prefetch = 0 : i64, scratch_operands = 0 : i64, tpu.core_type = #tpu.core_type<tc>, window_params = [{transform_indices = @transform_0, window_bounds = array<i64: 1, 22, 22>}, {transform_indices = @transform_1, window_bounds = array<i64: 50>}, {transform_indices = @transform_2, window_bounds = array<i64: 1, 16, 16>}]} {
    %c0 = arith.constant 0 : index
    %c0_0 = arith.constant 0 : index
    %c0_1 = arith.constant 0 : index
    %0 = vector.load %arg1[%c0, %c0_0, %c0_1] : memref<1x22x22xf32, #tpu.memory_space<vmem>>, vector<1x22x22xf32>
    %1 = vector.shape_cast %0 : vector<1x22x22xf32> to vector<22x22xf32>
    %2 = vector.extract_strided_slice %1 {offsets = [0, 0], sizes = [22, 16], strides = [1, 1]} : vector<22x22xf32> to vector<22x16xf32>
    %3 = vector.extract_strided_slice %1 {offsets = [0, 1], sizes = [22, 16], strides = [1, 1]} : vector<22x22xf32> to vector<22x16xf32>
    %4 = vector.extract_strided_slice %1 {offsets = [0, 2], sizes = [22, 16], strides = [1, 1]} : vector<22x22xf32> to vector<22x16xf32>
    %5 = vector.extract_strided_slice %1 {offsets = [0, 3], sizes = [22, 16], strides = [1, 1]} : vector<22x22xf32> to vector<22x16xf32>
    %6 = vector.extract_strided_slice %1 {offsets = [0, 4], sizes = [22, 16], strides = [1, 1]} : vector<22x22xf32> to vector<22x16xf32>
    %7 = vector.extract_strided_slice %1 {offsets = [0, 5], sizes = [22, 16], strides = [1, 1]} : vector<22x22xf32> to vector<22x16xf32>
    %8 = vector.extract_strided_slice %1 {offsets = [0, 6], sizes = [22, 16], strides = [1, 1]} : vector<22x22xf32> to vector<22x16xf32>
    %cst = arith.constant 0.000000e+00 : f32
    %9 = vector.broadcast %cst : f32 to vector<16x16xf32>
    %c0_2 = arith.constant 0 : index
    %10 = memref.load %arg2[%c0_2] : memref<50xf32, #tpu.memory_space<smem>>
    %11 = vector.extract_strided_slice %2 {offsets = [0, 0], sizes = [16, 16], strides = [1, 1]} : vector<22x16xf32> to vector<16x16xf32>
    %12 = vector.broadcast %10 : f32 to vector<16x16xf32>
    %13 = arith.mulf %12, %11 : vector<16x16xf32>
    %14 = arith.addf %9, %13 : vector<16x16xf32>
    %c1 = arith.constant 1 : index
    %15 = memref.load %arg2[%c1] : memref<50xf32, #tpu.memory_space<smem>>
    %16 = vector.extract_strided_slice %3 {offsets = [0, 0], sizes = [16, 16], strides = [1, 1]} : vector<22x16xf32> to vector<16x16xf32>
    %17 = vector.broadcast %15 : f32 to vector<16x16xf32>
    %18 = arith.mulf %17, %16 : vector<16x16xf32>
    %19 = arith.addf %14, %18 : vector<16x16xf32>
    %c2 = arith.constant 2 : index
    %20 = memref.load %arg2[%c2] : memref<50xf32, #tpu.memory_space<smem>>
    %21 = vector.extract_strided_slice %4 {offsets = [0, 0], sizes = [16, 16], strides = [1, 1]} : vector<22x16xf32> to vector<16x16xf32>
    %22 = vector.broadcast %20 : f32 to vector<16x16xf32>
    %23 = arith.mulf %22, %21 : vector<16x16xf32>
    %24 = arith.addf %19, %23 : vector<16x16xf32>
    %c3 = arith.constant 3 : index
    %25 = memref.load %arg2[%c3] : memref<50xf32, #tpu.memory_space<smem>>
    %26 = vector.extract_strided_slice %5 {offsets = [0, 0], sizes = [16, 16], strides = [1, 1]} : vector<22x16xf32> to vector<16x16xf32>
    %27 = vector.broadcast %25 : f32 to vector<16x16xf32>
    %28 = arith.mulf %27, %26 : vector<16x16xf32>
    %29 = arith.addf %24, %28 : vector<16x16xf32>
    %c4 = arith.constant 4 : index
    %30 = memref.load %arg2[%c4] : memref<50xf32, #tpu.memory_space<smem>>
    %31 = vector.extract_strided_slice %6 {offsets = [0, 0], sizes = [16, 16], strides = [1, 1]} : vector<22x16xf32> to vector<16x16xf32>
    %32 = vector.broadcast %30 : f32 to vector<16x16xf32>
    %33 = arith.mulf %32, %31 : vector<16x16xf32>
    %34 = arith.addf %29, %33 : vector<16x16xf32>
    %c5 = arith.constant 5 : index
    %35 = memref.load %arg2[%c5] : memref<50xf32, #tpu.memory_space<smem>>
    %36 = vector.extract_strided_slice %7 {offsets = [0, 0], sizes = [16, 16], strides = [1, 1]} : vector<22x16xf32> to vector<16x16xf32>
    %37 = vector.broadcast %35 : f32 to vector<16x16xf32>
    %38 = arith.mulf %37, %36 : vector<16x16xf32>
    %39 = arith.addf %34, %38 : vector<16x16xf32>
    %c6 = arith.constant 6 : index
    %40 = memref.load %arg2[%c6] : memref<50xf32, #tpu.memory_space<smem>>
    %41 = vector.extract_strided_slice %8 {offsets = [0, 0], sizes = [16, 16], strides = [1, 1]} : vector<22x16xf32> to vector<16x16xf32>
    %42 = vector.broadcast %40 : f32 to vector<16x16xf32>
    %43 = arith.mulf %42, %41 : vector<16x16xf32>
    %44 = arith.addf %39, %43 : vector<16x16xf32>
    %c7 = arith.constant 7 : index
    %45 = memref.load %arg2[%c7] : memref<50xf32, #tpu.memory_space<smem>>
    %46 = vector.extract_strided_slice %2 {offsets = [1, 0], sizes = [16, 16], strides = [1, 1]} : vector<22x16xf32> to vector<16x16xf32>
    %47 = vector.broadcast %45 : f32 to vector<16x16xf32>
    %48 = arith.mulf %47, %46 : vector<16x16xf32>
    %49 = arith.addf %44, %48 : vector<16x16xf32>
    %c8 = arith.constant 8 : index
    %50 = memref.load %arg2[%c8] : memref<50xf32, #tpu.memory_space<smem>>
    %51 = vector.extract_strided_slice %3 {offsets = [1, 0], sizes = [16, 16], strides = [1, 1]} : vector<22x16xf32> to vector<16x16xf32>
    %52 = vector.broadcast %50 : f32 to vector<16x16xf32>
    %53 = arith.mulf %52, %51 : vector<16x16xf32>
    %54 = arith.addf %49, %53 : vector<16x16xf32>
    %c9 = arith.constant 9 : index
    %55 = memref.load %arg2[%c9] : memref<50xf32, #tpu.memory_space<smem>>
    %56 = vector.extract_strided_slice %4 {offsets = [1, 0], sizes = [16, 16], strides = [1, 1]} : vector<22x16xf32> to vector<16x16xf32>
    %57 = vector.broadcast %55 : f32 to vector<16x16xf32>
    %58 = arith.mulf %57, %56 : vector<16x16xf32>
    %59 = arith.addf %54, %58 : vector<16x16xf32>
    %c10 = arith.constant 10 : index
    %60 = memref.load %arg2[%c10] : memref<50xf32, #tpu.memory_space<smem>>
    %61 = vector.extract_strided_slice %5 {offsets = [1, 0], sizes = [16, 16], strides = [1, 1]} : vector<22x16xf32> to vector<16x16xf32>
    %62 = vector.broadcast %60 : f32 to vector<16x16xf32>
    %63 = arith.mulf %62, %61 : vector<16x16xf32>
    %64 = arith.addf %59, %63 : vector<16x16xf32>
    %c11 = arith.constant 11 : index
    %65 = memref.load %arg2[%c11] : memref<50xf32, #tpu.memory_space<smem>>
    %66 = vector.extract_strided_slice %6 {offsets = [1, 0], sizes = [16, 16], strides = [1, 1]} : vector<22x16xf32> to vector<16x16xf32>
    %67 = vector.broadcast %65 : f32 to vector<16x16xf32>
    %68 = arith.mulf %67, %66 : vector<16x16xf32>
    %69 = arith.addf %64, %68 : vector<16x16xf32>
    %c12 = arith.constant 12 : index
    %70 = memref.load %arg2[%c12] : memref<50xf32, #tpu.memory_space<smem>>
    %71 = vector.extract_strided_slice %7 {offsets = [1, 0], sizes = [16, 16], strides = [1, 1]} : vector<22x16xf32> to vector<16x16xf32>
    %72 = vector.broadcast %70 : f32 to vector<16x16xf32>
    %73 = arith.mulf %72, %71 : vector<16x16xf32>
    %74 = arith.addf %69, %73 : vector<16x16xf32>
    %c13 = arith.constant 13 : index
    %75 = memref.load %arg2[%c13] : memref<50xf32, #tpu.memory_space<smem>>
    %76 = vector.extract_strided_slice %8 {offsets = [1, 0], sizes = [16, 16], strides = [1, 1]} : vector<22x16xf32> to vector<16x16xf32>
    %77 = vector.broadcast %75 : f32 to vector<16x16xf32>
    %78 = arith.mulf %77, %76 : vector<16x16xf32>
    %79 = arith.addf %74, %78 : vector<16x16xf32>
    %c14 = arith.constant 14 : index
    %80 = memref.load %arg2[%c14] : memref<50xf32, #tpu.memory_space<smem>>
    %81 = vector.extract_strided_slice %2 {offsets = [2, 0], sizes = [16, 16], strides = [1, 1]} : vector<22x16xf32> to vector<16x16xf32>
    %82 = vector.broadcast %80 : f32 to vector<16x16xf32>
    %83 = arith.mulf %82, %81 : vector<16x16xf32>
    %84 = arith.addf %79, %83 : vector<16x16xf32>
    %c15 = arith.constant 15 : index
    %85 = memref.load %arg2[%c15] : memref<50xf32, #tpu.memory_space<smem>>
    %86 = vector.extract_strided_slice %3 {offsets = [2, 0], sizes = [16, 16], strides = [1, 1]} : vector<22x16xf32> to vector<16x16xf32>
    %87 = vector.broadcast %85 : f32 to vector<16x16xf32>
    %88 = arith.mulf %87, %86 : vector<16x16xf32>
    %89 = arith.addf %84, %88 : vector<16x16xf32>
    %c16 = arith.constant 16 : index
    %90 = memref.load %arg2[%c16] : memref<50xf32, #tpu.memory_space<smem>>
    %91 = vector.extract_strided_slice %4 {offsets = [2, 0], sizes = [16, 16], strides = [1, 1]} : vector<22x16xf32> to vector<16x16xf32>
    %92 = vector.broadcast %90 : f32 to vector<16x16xf32>
    %93 = arith.mulf %92, %91 : vector<16x16xf32>
    %94 = arith.addf %89, %93 : vector<16x16xf32>
    %c17 = arith.constant 17 : index
    %95 = memref.load %arg2[%c17] : memref<50xf32, #tpu.memory_space<smem>>
    %96 = vector.extract_strided_slice %5 {offsets = [2, 0], sizes = [16, 16], strides = [1, 1]} : vector<22x16xf32> to vector<16x16xf32>
    %97 = vector.broadcast %95 : f32 to vector<16x16xf32>
    %98 = arith.mulf %97, %96 : vector<16x16xf32>
    %99 = arith.addf %94, %98 : vector<16x16xf32>
    %c18 = arith.constant 18 : index
    %100 = memref.load %arg2[%c18] : memref<50xf32, #tpu.memory_space<smem>>
    %101 = vector.extract_strided_slice %6 {offsets = [2, 0], sizes = [16, 16], strides = [1, 1]} : vector<22x16xf32> to vector<16x16xf32>
    %102 = vector.broadcast %100 : f32 to vector<16x16xf32>
    %103 = arith.mulf %102, %101 : vector<16x16xf32>
    %104 = arith.addf %99, %103 : vector<16x16xf32>
    %c19 = arith.constant 19 : index
    %105 = memref.load %arg2[%c19] : memref<50xf32, #tpu.memory_space<smem>>
    %106 = vector.extract_strided_slice %7 {offsets = [2, 0], sizes = [16, 16], strides = [1, 1]} : vector<22x16xf32> to vector<16x16xf32>
    %107 = vector.broadcast %105 : f32 to vector<16x16xf32>
    %108 = arith.mulf %107, %106 : vector<16x16xf32>
    %109 = arith.addf %104, %108 : vector<16x16xf32>
    %c20 = arith.constant 20 : index
    %110 = memref.load %arg2[%c20] : memref<50xf32, #tpu.memory_space<smem>>
    %111 = vector.extract_strided_slice %8 {offsets = [2, 0], sizes = [16, 16], strides = [1, 1]} : vector<22x16xf32> to vector<16x16xf32>
    %112 = vector.broadcast %110 : f32 to vector<16x16xf32>
    %113 = arith.mulf %112, %111 : vector<16x16xf32>
    %114 = arith.addf %109, %113 : vector<16x16xf32>
    %c21 = arith.constant 21 : index
    %115 = memref.load %arg2[%c21] : memref<50xf32, #tpu.memory_space<smem>>
    %116 = vector.extract_strided_slice %2 {offsets = [3, 0], sizes = [16, 16], strides = [1, 1]} : vector<22x16xf32> to vector<16x16xf32>
    %117 = vector.broadcast %115 : f32 to vector<16x16xf32>
    %118 = arith.mulf %117, %116 : vector<16x16xf32>
    %119 = arith.addf %114, %118 : vector<16x16xf32>
    %c22 = arith.constant 22 : index
    %120 = memref.load %arg2[%c22] : memref<50xf32, #tpu.memory_space<smem>>
    %121 = vector.extract_strided_slice %3 {offsets = [3, 0], sizes = [16, 16], strides = [1, 1]} : vector<22x16xf32> to vector<16x16xf32>
    %122 = vector.broadcast %120 : f32 to vector<16x16xf32>
    %123 = arith.mulf %122, %121 : vector<16x16xf32>
    %124 = arith.addf %119, %123 : vector<16x16xf32>
    %c23 = arith.constant 23 : index
    %125 = memref.load %arg2[%c23] : memref<50xf32, #tpu.memory_space<smem>>
    %126 = vector.extract_strided_slice %4 {offsets = [3, 0], sizes = [16, 16], strides = [1, 1]} : vector<22x16xf32> to vector<16x16xf32>
    %127 = vector.broadcast %125 : f32 to vector<16x16xf32>
    %128 = arith.mulf %127, %126 : vector<16x16xf32>
    %129 = arith.addf %124, %128 : vector<16x16xf32>
    %c24 = arith.constant 24 : index
    %130 = memref.load %arg2[%c24] : memref<50xf32, #tpu.memory_space<smem>>
    %131 = vector.extract_strided_slice %5 {offsets = [3, 0], sizes = [16, 16], strides = [1, 1]} : vector<22x16xf32> to vector<16x16xf32>
    %132 = vector.broadcast %130 : f32 to vector<16x16xf32>
    %133 = arith.mulf %132, %131 : vector<16x16xf32>
    %134 = arith.addf %129, %133 : vector<16x16xf32>
    %c25 = arith.constant 25 : index
    %135 = memref.load %arg2[%c25] : memref<50xf32, #tpu.memory_space<smem>>
    %136 = vector.extract_strided_slice %6 {offsets = [3, 0], sizes = [16, 16], strides = [1, 1]} : vector<22x16xf32> to vector<16x16xf32>
    %137 = vector.broadcast %135 : f32 to vector<16x16xf32>
    %138 = arith.mulf %137, %136 : vector<16x16xf32>
    %139 = arith.addf %134, %138 : vector<16x16xf32>
    %c26 = arith.constant 26 : index
    %140 = memref.load %arg2[%c26] : memref<50xf32, #tpu.memory_space<smem>>
    %141 = vector.extract_strided_slice %7 {offsets = [3, 0], sizes = [16, 16], strides = [1, 1]} : vector<22x16xf32> to vector<16x16xf32>
    %142 = vector.broadcast %140 : f32 to vector<16x16xf32>
    %143 = arith.mulf %142, %141 : vector<16x16xf32>
    %144 = arith.addf %139, %143 : vector<16x16xf32>
    %c27 = arith.constant 27 : index
    %145 = memref.load %arg2[%c27] : memref<50xf32, #tpu.memory_space<smem>>
    %146 = vector.extract_strided_slice %8 {offsets = [3, 0], sizes = [16, 16], strides = [1, 1]} : vector<22x16xf32> to vector<16x16xf32>
    %147 = vector.broadcast %145 : f32 to vector<16x16xf32>
    %148 = arith.mulf %147, %146 : vector<16x16xf32>
    %149 = arith.addf %144, %148 : vector<16x16xf32>
    %c28 = arith.constant 28 : index
    %150 = memref.load %arg2[%c28] : memref<50xf32, #tpu.memory_space<smem>>
    %151 = vector.extract_strided_slice %2 {offsets = [4, 0], sizes = [16, 16], strides = [1, 1]} : vector<22x16xf32> to vector<16x16xf32>
    %152 = vector.broadcast %150 : f32 to vector<16x16xf32>
    %153 = arith.mulf %152, %151 : vector<16x16xf32>
    %154 = arith.addf %149, %153 : vector<16x16xf32>
    %c29 = arith.constant 29 : index
    %155 = memref.load %arg2[%c29] : memref<50xf32, #tpu.memory_space<smem>>
    %156 = vector.extract_strided_slice %3 {offsets = [4, 0], sizes = [16, 16], strides = [1, 1]} : vector<22x16xf32> to vector<16x16xf32>
    %157 = vector.broadcast %155 : f32 to vector<16x16xf32>
    %158 = arith.mulf %157, %156 : vector<16x16xf32>
    %159 = arith.addf %154, %158 : vector<16x16xf32>
    %c30 = arith.constant 30 : index
    %160 = memref.load %arg2[%c30] : memref<50xf32, #tpu.memory_space<smem>>
    %161 = vector.extract_strided_slice %4 {offsets = [4, 0], sizes = [16, 16], strides = [1, 1]} : vector<22x16xf32> to vector<16x16xf32>
    %162 = vector.broadcast %160 : f32 to vector<16x16xf32>
    %163 = arith.mulf %162, %161 : vector<16x16xf32>
    %164 = arith.addf %159, %163 : vector<16x16xf32>
    %c31 = arith.constant 31 : index
    %165 = memref.load %arg2[%c31] : memref<50xf32, #tpu.memory_space<smem>>
    %166 = vector.extract_strided_slice %5 {offsets = [4, 0], sizes = [16, 16], strides = [1, 1]} : vector<22x16xf32> to vector<16x16xf32>
    %167 = vector.broadcast %165 : f32 to vector<16x16xf32>
    %168 = arith.mulf %167, %166 : vector<16x16xf32>
    %169 = arith.addf %164, %168 : vector<16x16xf32>
    %c32 = arith.constant 32 : index
    %170 = memref.load %arg2[%c32] : memref<50xf32, #tpu.memory_space<smem>>
    %171 = vector.extract_strided_slice %6 {offsets = [4, 0], sizes = [16, 16], strides = [1, 1]} : vector<22x16xf32> to vector<16x16xf32>
    %172 = vector.broadcast %170 : f32 to vector<16x16xf32>
    %173 = arith.mulf %172, %171 : vector<16x16xf32>
    %174 = arith.addf %169, %173 : vector<16x16xf32>
    %c33 = arith.constant 33 : index
    %175 = memref.load %arg2[%c33] : memref<50xf32, #tpu.memory_space<smem>>
    %176 = vector.extract_strided_slice %7 {offsets = [4, 0], sizes = [16, 16], strides = [1, 1]} : vector<22x16xf32> to vector<16x16xf32>
    %177 = vector.broadcast %175 : f32 to vector<16x16xf32>
    %178 = arith.mulf %177, %176 : vector<16x16xf32>
    %179 = arith.addf %174, %178 : vector<16x16xf32>
    %c34 = arith.constant 34 : index
    %180 = memref.load %arg2[%c34] : memref<50xf32, #tpu.memory_space<smem>>
    %181 = vector.extract_strided_slice %8 {offsets = [4, 0], sizes = [16, 16], strides = [1, 1]} : vector<22x16xf32> to vector<16x16xf32>
    %182 = vector.broadcast %180 : f32 to vector<16x16xf32>
    %183 = arith.mulf %182, %181 : vector<16x16xf32>
    %184 = arith.addf %179, %183 : vector<16x16xf32>
    %c35 = arith.constant 35 : index
    %185 = memref.load %arg2[%c35] : memref<50xf32, #tpu.memory_space<smem>>
    %186 = vector.extract_strided_slice %2 {offsets = [5, 0], sizes = [16, 16], strides = [1, 1]} : vector<22x16xf32> to vector<16x16xf32>
    %187 = vector.broadcast %185 : f32 to vector<16x16xf32>
    %188 = arith.mulf %187, %186 : vector<16x16xf32>
    %189 = arith.addf %184, %188 : vector<16x16xf32>
    %c36 = arith.constant 36 : index
    %190 = memref.load %arg2[%c36] : memref<50xf32, #tpu.memory_space<smem>>
    %191 = vector.extract_strided_slice %3 {offsets = [5, 0], sizes = [16, 16], strides = [1, 1]} : vector<22x16xf32> to vector<16x16xf32>
    %192 = vector.broadcast %190 : f32 to vector<16x16xf32>
    %193 = arith.mulf %192, %191 : vector<16x16xf32>
    %194 = arith.addf %189, %193 : vector<16x16xf32>
    %c37 = arith.constant 37 : index
    %195 = memref.load %arg2[%c37] : memref<50xf32, #tpu.memory_space<smem>>
    %196 = vector.extract_strided_slice %4 {offsets = [5, 0], sizes = [16, 16], strides = [1, 1]} : vector<22x16xf32> to vector<16x16xf32>
    %197 = vector.broadcast %195 : f32 to vector<16x16xf32>
    %198 = arith.mulf %197, %196 : vector<16x16xf32>
    %199 = arith.addf %194, %198 : vector<16x16xf32>
    %c38 = arith.constant 38 : index
    %200 = memref.load %arg2[%c38] : memref<50xf32, #tpu.memory_space<smem>>
    %201 = vector.extract_strided_slice %5 {offsets = [5, 0], sizes = [16, 16], strides = [1, 1]} : vector<22x16xf32> to vector<16x16xf32>
    %202 = vector.broadcast %200 : f32 to vector<16x16xf32>
    %203 = arith.mulf %202, %201 : vector<16x16xf32>
    %204 = arith.addf %199, %203 : vector<16x16xf32>
    %c39 = arith.constant 39 : index
    %205 = memref.load %arg2[%c39] : memref<50xf32, #tpu.memory_space<smem>>
    %206 = vector.extract_strided_slice %6 {offsets = [5, 0], sizes = [16, 16], strides = [1, 1]} : vector<22x16xf32> to vector<16x16xf32>
    %207 = vector.broadcast %205 : f32 to vector<16x16xf32>
    %208 = arith.mulf %207, %206 : vector<16x16xf32>
    %209 = arith.addf %204, %208 : vector<16x16xf32>
    %c40 = arith.constant 40 : index
    %210 = memref.load %arg2[%c40] : memref<50xf32, #tpu.memory_space<smem>>
    %211 = vector.extract_strided_slice %7 {offsets = [5, 0], sizes = [16, 16], strides = [1, 1]} : vector<22x16xf32> to vector<16x16xf32>
    %212 = vector.broadcast %210 : f32 to vector<16x16xf32>
    %213 = arith.mulf %212, %211 : vector<16x16xf32>
    %214 = arith.addf %209, %213 : vector<16x16xf32>
    %c41 = arith.constant 41 : index
    %215 = memref.load %arg2[%c41] : memref<50xf32, #tpu.memory_space<smem>>
    %216 = vector.extract_strided_slice %8 {offsets = [5, 0], sizes = [16, 16], strides = [1, 1]} : vector<22x16xf32> to vector<16x16xf32>
    %217 = vector.broadcast %215 : f32 to vector<16x16xf32>
    %218 = arith.mulf %217, %216 : vector<16x16xf32>
    %219 = arith.addf %214, %218 : vector<16x16xf32>
    %c42 = arith.constant 42 : index
    %220 = memref.load %arg2[%c42] : memref<50xf32, #tpu.memory_space<smem>>
    %221 = vector.extract_strided_slice %2 {offsets = [6, 0], sizes = [16, 16], strides = [1, 1]} : vector<22x16xf32> to vector<16x16xf32>
    %222 = vector.broadcast %220 : f32 to vector<16x16xf32>
    %223 = arith.mulf %222, %221 : vector<16x16xf32>
    %224 = arith.addf %219, %223 : vector<16x16xf32>
    %c43 = arith.constant 43 : index
    %225 = memref.load %arg2[%c43] : memref<50xf32, #tpu.memory_space<smem>>
    %226 = vector.extract_strided_slice %3 {offsets = [6, 0], sizes = [16, 16], strides = [1, 1]} : vector<22x16xf32> to vector<16x16xf32>
    %227 = vector.broadcast %225 : f32 to vector<16x16xf32>
    %228 = arith.mulf %227, %226 : vector<16x16xf32>
    %229 = arith.addf %224, %228 : vector<16x16xf32>
    %c44 = arith.constant 44 : index
    %230 = memref.load %arg2[%c44] : memref<50xf32, #tpu.memory_space<smem>>
    %231 = vector.extract_strided_slice %4 {offsets = [6, 0], sizes = [16, 16], strides = [1, 1]} : vector<22x16xf32> to vector<16x16xf32>
    %232 = vector.broadcast %230 : f32 to vector<16x16xf32>
    %233 = arith.mulf %232, %231 : vector<16x16xf32>
    %234 = arith.addf %229, %233 : vector<16x16xf32>
    %c45 = arith.constant 45 : index
    %235 = memref.load %arg2[%c45] : memref<50xf32, #tpu.memory_space<smem>>
    %236 = vector.extract_strided_slice %5 {offsets = [6, 0], sizes = [16, 16], strides = [1, 1]} : vector<22x16xf32> to vector<16x16xf32>
    %237 = vector.broadcast %235 : f32 to vector<16x16xf32>
    %238 = arith.mulf %237, %236 : vector<16x16xf32>
    %239 = arith.addf %234, %238 : vector<16x16xf32>
    %c46 = arith.constant 46 : index
    %240 = memref.load %arg2[%c46] : memref<50xf32, #tpu.memory_space<smem>>
    %241 = vector.extract_strided_slice %6 {offsets = [6, 0], sizes = [16, 16], strides = [1, 1]} : vector<22x16xf32> to vector<16x16xf32>
    %242 = vector.broadcast %240 : f32 to vector<16x16xf32>
    %243 = arith.mulf %242, %241 : vector<16x16xf32>
    %244 = arith.addf %239, %243 : vector<16x16xf32>
    %c47 = arith.constant 47 : index
    %245 = memref.load %arg2[%c47] : memref<50xf32, #tpu.memory_space<smem>>
    %246 = vector.extract_strided_slice %7 {offsets = [6, 0], sizes = [16, 16], strides = [1, 1]} : vector<22x16xf32> to vector<16x16xf32>
    %247 = vector.broadcast %245 : f32 to vector<16x16xf32>
    %248 = arith.mulf %247, %246 : vector<16x16xf32>
    %249 = arith.addf %244, %248 : vector<16x16xf32>
    %c48 = arith.constant 48 : index
    %250 = memref.load %arg2[%c48] : memref<50xf32, #tpu.memory_space<smem>>
    %251 = vector.extract_strided_slice %8 {offsets = [6, 0], sizes = [16, 16], strides = [1, 1]} : vector<22x16xf32> to vector<16x16xf32>
    %252 = vector.broadcast %250 : f32 to vector<16x16xf32>
    %253 = arith.mulf %252, %251 : vector<16x16xf32>
    %254 = arith.addf %249, %253 : vector<16x16xf32>
    %c49 = arith.constant 49 : index
    %255 = memref.load %arg2[%c49] : memref<50xf32, #tpu.memory_space<smem>>
    %256 = vector.broadcast %255 : f32 to vector<16x16xf32>
    %257 = arith.addf %254, %256 : vector<16x16xf32>
    %258 = arith.negf %257 : vector<16x16xf32>
    %259 = math.exp %258 : vector<16x16xf32>
    %cst_3 = arith.constant 1.000000e+00 : f32
    %260 = vector.broadcast %cst_3 : f32 to vector<16x16xf32>
    %261 = arith.addf %260, %259 : vector<16x16xf32>
    %262 = arith.divf %260, %261 : vector<16x16xf32>
    %c0_4 = arith.constant 0 : index
    %c0_5 = arith.constant 0 : index
    %c0_6 = arith.constant 0 : index
    %263 = vector.load %arg3[%c0_4, %c0_5, %c0_6] : memref<1x16x16xf32, #tpu.memory_space<vmem>>, vector<1x16x16xf32>
    %264 = vector.shape_cast %263 : vector<1x16x16xf32> to vector<16x16xf32>
    %265 = vector.shape_cast %262 : vector<16x16xf32> to vector<1x16x16xf32>
    tpu.vector_store %arg3[%c0_4, %c0_5, %c0_6], %265 {strides = array<i32>} : memref<1x16x16xf32, #tpu.memory_space<vmem>>, vector<1x16x16xf32>,
    return
  }
  func.func @transform_0(%arg0: i32) -> (i32, i32, i32) {
    %c0_i32 = arith.constant 0 : i32
    %c0_i32_0 = arith.constant 0 : i32
    %c0_i32_1 = arith.constant 0 : i32
    return %arg0, %c0_i32, %c0_i32_0 : i32, i32, i32
  }
  func.func @transform_1(%arg0: i32) -> i32 {
    %c0_i32 = arith.constant 0 : i32
    %c0_i32_0 = arith.constant 0 : i32
    return %c0_i32 : i32
  }
  func.func @transform_2(%arg0: i32) -> (i32, i32, i32) {
    %c0_i32 = arith.constant 0 : i32
    %c0_i32_0 = arith.constant 0 : i32
    %c0_i32_1 = arith.constant 0 : i32
    return %arg0, %c0_i32, %c0_i32_0 : i32, i32, i32
  }
}

module attributes {stable_mosaic.version = 11 : i64} {
  func.func @_rescale_kernel(%arg0: i32, %arg1: i32, %arg2: memref<1x8x256xf32, #tpu.memory_space<vmem>>, %arg3: memref<1x8x1xf32, #tpu.memory_space<vmem>>, %arg4: memref<1x1x256xf32, #tpu.memory_space<vmem>>, %arg5: memref<1x8x256xf32, #tpu.memory_space<vmem>>) attributes {dimension_semantics = [#tpu.dimension_semantics<parallel>, #tpu.dimension_semantics<parallel>], iteration_bounds = array<i64: 2, 1>, scalar_prefetch = 0 : i64, scratch_operands = 0 : i64, tpu.core_type = #tpu.core_type<tc>, window_params = [{transform_indices = @transform_0, window_bounds = array<i64: 1, 8, 256>}, {transform_indices = @transform_1, window_bounds = array<i64: 1, 8, 1>}, {transform_indices = @transform_2, window_bounds = array<i64: 1, 1, 256>}, {transform_indices = @transform_3, window_bounds = array<i64: 1, 8, 256>}]} {
    %c0 = arith.constant 0 : index
    %c0_0 = arith.constant 0 : index
    %c0_1 = arith.constant 0 : index
    %0 = vector.load %arg2[%c0, %c0_0, %c0_1] : memref<1x8x256xf32, #tpu.memory_space<vmem>>, vector<1x8x256xf32>
    %1 = vector.shape_cast %0 : vector<1x8x256xf32> to vector<8x256xf32>
    %c0_2 = arith.constant 0 : index
    %c0_3 = arith.constant 0 : index
    %c0_4 = arith.constant 0 : index
    %2 = vector.load %arg3[%c0_2, %c0_3, %c0_4] : memref<1x8x1xf32, #tpu.memory_space<vmem>>, vector<1x8x1xf32>
    %3 = vector.shape_cast %2 : vector<1x8x1xf32> to vector<8x1xf32>
    %4 = vector.broadcast %3 : vector<8x1xf32> to vector<8x256xf32>
    %5 = arith.mulf %1, %4 : vector<8x256xf32>
    %c0_5 = arith.constant 0 : index
    %c0_6 = arith.constant 0 : index
    %c0_7 = arith.constant 0 : index
    %6 = vector.load %arg4[%c0_5, %c0_6, %c0_7] : memref<1x1x256xf32, #tpu.memory_space<vmem>>, vector<1x1x256xf32>
    %7 = vector.shape_cast %6 : vector<1x1x256xf32> to vector<1x256xf32>
    %8 = vector.broadcast %7 : vector<1x256xf32> to vector<8x256xf32>
    %9 = arith.mulf %5, %8 : vector<8x256xf32>
    %c0_8 = arith.constant 0 : index
    %c0_9 = arith.constant 0 : index
    %c0_10 = arith.constant 0 : index
    %10 = vector.load %arg5[%c0_8, %c0_9, %c0_10] : memref<1x8x256xf32, #tpu.memory_space<vmem>>, vector<1x8x256xf32>
    %11 = vector.shape_cast %10 : vector<1x8x256xf32> to vector<8x256xf32>
    %12 = vector.shape_cast %9 : vector<8x256xf32> to vector<1x8x256xf32>
    tpu.vector_store %arg5[%c0_8, %c0_9, %c0_10], %12 {strides = array<i32>} : memref<1x8x256xf32, #tpu.memory_space<vmem>>, vector<1x8x256xf32>,
    return
  }
  func.func @transform_0(%arg0: i32, %arg1: i32) -> (i32, i32, i32) {
    %c0_i32 = arith.constant 0 : i32
    %c0_i32_0 = arith.constant 0 : i32
    return %arg0, %arg1, %c0_i32 : i32, i32, i32
  }
  func.func @transform_1(%arg0: i32, %arg1: i32) -> (i32, i32, i32) {
    %c0_i32 = arith.constant 0 : i32
    %c0_i32_0 = arith.constant 0 : i32
    return %arg0, %arg1, %c0_i32 : i32, i32, i32
  }
  func.func @transform_2(%arg0: i32, %arg1: i32) -> (i32, i32, i32) {
    %c0_i32 = arith.constant 0 : i32
    %c0_i32_0 = arith.constant 0 : i32
    %c0_i32_1 = arith.constant 0 : i32
    return %arg0, %c0_i32, %c0_i32_0 : i32, i32, i32
  }
  func.func @transform_3(%arg0: i32, %arg1: i32) -> (i32, i32, i32) {
    %c0_i32 = arith.constant 0 : i32
    %c0_i32_0 = arith.constant 0 : i32
    return %arg0, %arg1, %c0_i32 : i32, i32, i32
  }
}

</mosaic_0001>

<bundles_post_ra>
// kernel: ebam.4
= control target key start
LH: loop header
LB: loop body
LE: loop exit
PB: predicated region body
PF: predicated region fallthrough
CT: control target
= control target key end

     0   :  { %s346_s6 = smov 0   ;;  %s348_s7 = smov 0   ;;  %s383_s0 = inlined_call_operand.vmem [shape: f32[2,8,256], index: 0, kind: input, shape index: {}]   ;;  %s384_s1 = inlined_call_operand.vmem [shape: f32[2,8,1], index: 1, kind: output, shape index: {}]  }
   0x1   :  { %s350_s8 = smov 0  }
   0x2 LB: > { %s23_s9 = sadd.s32 1, %s330_s7  ;;  %p273_p0 = scmp.ge.s32.totalorder %s334_s8, 1  ;;  %s334_s8 = sphi %s350_s8, %s11_s8   ;;  %s330_s7 = sphi %s348_s7, %s386_s7   ;;  %s326_s6 = sphi %s346_s6, %s385_s6  }
   0x3   : > { %p25_p1 = scmp.ge.s32.totalorder %s23_s9, 2  ;;  %p107_p2 = scmp.lt.s32.totalorder %s334_s8, 3 }
   0x5   : > { %s388_s9 = smov (%p25_p1, %s23_s9), 0  ;;  %p108_p3 = pnand %p273_p0, %p107_p2 }
   0x6   : > { %p133_p4 = scmp.lt.s32.totalorder (!%p108_p3), %s326_s6, 1 }
   0x7   : > { %111 = sbr.rel (%p108_p3) target bundleno = 288 (0x120), region = 24 }
   0xc   : > { %s390_s6 = smov (!%p133_p4, %s326_s6), 1  ;;  %vm187_vm4 = vcmask 7168  }
   0xd   : > { %s279_s10 = sshll.u32 %s390_s6, 4  ;;  %s276_s14 = sshll.u32 %s390_s6, 3 }
   0xe   : > { %s141_s13 = scalar_lea.vmem %s383_s0, %s279_s10  ;;  %s148_s17 = scalar_lea.vmem %s384_s1, %s276_s14 }
   0xf   : > { %v149_v0 = vld [vmem:[%s141_s13] sm:$0xff]  ;;  %v150_v1 = vld [vmem:[%s141_s13 + $0x8] sm:$0xff] }
  0x10   : > { %v151_v2 = vmax.f32 %v149_v0, %v150_v1 }
  0x12   : > { %152 = vmax.xlane.f32.xlu0 %v151_v2 }
  0x85   : > { %v153_v3 = vpop.xlane.xlu0 %152 }
  0x86   : > { %v154_v4 = vsub.f32 %v149_v0, %v153_v3  ;;  %v155_v5 = vsub.f32 %v150_v1, %v153_v3 }
  0x88   : > { %v156_v6 = vmul.f32 1.442695, %v154_v4  ;;  %v158_v7 = vmul.f32 1.442695, %v155_v5 }
  0x8a   : > { %304 = vpow2.f32 %v156_v6 }
  0x8b   : > { %306 = vpow2.f32 %v158_v7 }
  0x90   : > { %v305_v8 = vpop.eup %304 }
  0x91   : > { %v307_v9 = vpop.eup %306  ;;  %v163_v10 = vmul.f32 %v305_v8, %v154_v4 }
  0x92   : > { %v160_v11 = vadd.f32 %v307_v9, %v305_v8  ;;  %v164_v12 = vmul.f32 %v307_v9, %v155_v5 }
  0x94   : > { %161 = vadd.xlane.f32.xlu0 %v160_v11  ;;  %v165_v13 = vadd.f32 %v164_v12, %v163_v10 }
  0x96   : > { %166 = vadd.xlane.f32.xlu1 %v165_v13 }
 0x107   : > { %v162_v14 = vpop.xlane.xlu0 %161 }
 0x108   : > { %308 = vrcp.f32 %v162_v14  ;;  %v181_v18 = vand.u32 2147483648, %v162_v14  ;;  %v179_v20 = vand.u32 2147483647, %v162_v14  ;;  %vm175_vm1 = vweird.f32 %v162_v14 }
 0x109   : > { %310 = vlog2.f32 %v162_v14  ;;  %v167_v25 = vpop.xlane.xlu1 %166 }
 0x10a   : > { %v182_v23 = vor.u32 1.1754944e-38, %v181_v18  ;;  %vm180_vm3 = vcmp.eq.f32.partialorder %v179_v20, 8.507059e+37 }
 0x10e   : > { %v309_v15 = vpop.eup %308 }
 0x10f   : > { %v171_v16 = vmul.f32 %v309_v15, %v162_v14  ;;  %vm176_vm0 = vweird.f32 %v309_v15  ;;  %v311_v22 = vpop.eup %310 }
 0x110   : > { %vm177_vm2 = vmor %vm175_vm1, %vm176_vm0  ;;  %v169_v27 = vmul.f32 0.6931472, %v311_v22 }
 0x111   : > { %v172_v17 = vsub.f32 1.0, %v171_v16 }
 0x113   : > { %v173_v19 = vmul.f32 %v309_v15, %v172_v17 }
 0x115   : > { %v174_v21 = vadd.f32 %v309_v15, %v173_v19 }
 0x117   : > { %v178_v24 = vsel %vm177_vm2, %v309_v15, %v174_v21 }
 0x118   : > { %v183_v26 = vsel %vm180_vm3, %v182_v23, %v178_v24 }
 0x119   : > { %v184_v28 = vmul.f32 %v183_v26, %v167_v25 }
 0x11b   : > { %v185_v29 = vsub.f32 %v169_v27, %v184_v28 }
 0x11d   : > { %v186_v30 = vmul.f32 1.442695, %v185_v29 }
 0x11f   : > { %188 = vst.msk [vmem:[%s148_s17] sm:$0xff] %vm187_vm4, %v186_v30 }
 0x120 PF: > { %s11_s8 = sadd.s32 1, %s334_s8   ;;  %s385_s6 = smov %s330_s7 }
 0x121   : > { %p8_p5 = scmp.ge.s32.totalorder %s11_s8, 4   ;;  %s386_s7 = smov %s388_s9 }
 0x123   :  { %10 = sbr.rel (!%p8_p5) target bundleno = 2 (0x2), region = 54 }

// kernel: ebam.5
= control target key start
LH: loop header
LB: loop body
LE: loop exit
PB: predicated region body
PF: predicated region fallthrough
CT: control target
= control target key end

     0   :  { %s1081_s9 = smov 0   ;;  %s1083_s10 = smov 0   ;;  %s1672_s0 = inlined_call_operand.vmem [shape: f32[2,8,16,16], index: 0, kind: input, shape index: {}]   ;;  %s1673_s1 = inlined_call_operand.vmem [shape: f32[2,8,1,1], index: 1, kind: input, shape index: {}]   ;;  %s1674_s2 = inlined_call_operand.vmem [shape: f32[2,16,16], index: 2, kind: output, shape index: {}]  }
   0x1   :  { %s1085_s11 = smov 0  }
   0x2 LB: > { %s24_s12 = sadd.s32 1, %s1058_s10  ;;  %p897_p0 = scmp.ge.s32.totalorder %s1062_s11, 1  ;;  %s1062_s11 = sphi %s1085_s11, %s12_s11   ;;  %s1058_s10 = sphi %s1083_s10, %s1710_s10   ;;  %s1054_s9 = sphi %s1081_s9, %s1709_s9  }
   0x3   : > { %p26_p1 = scmp.ge.s32.totalorder %s24_s12, 2  ;;  %p148_p2 = scmp.lt.s32.totalorder %s1062_s11, 3 }
   0x5   : > { %s1712_s12 = smov (%p26_p1, %s24_s12), 0  ;;  %p149_p3 = pnand %p897_p0, %p148_p2 }
   0x6   : > { %p184_p4 = scmp.lt.s32.totalorder (!%p149_p3), %s1054_s9, 1 }
   0x7   : > { %152 = sbr.rel (%p149_p3) target bundleno = 476 (0x1dc), region = 28 }
   0xc   : > { %v1064_v0 = vmov 0   ;;  %s1714_s9 = smov (!%p184_p4, %s1054_s9), 1  ;;  %vm212_vm0 = vcmask 130048  }
   0xd   : > { %934 = vset.pattern.permute.xlu1 %v1064_v0  ;;  %933 = vset.pattern.permute.xlu0 %v1064_v0  ;;  %s900_s13 = sshll.u32 %s1714_s9, 3  ;;  %s905_s17 = sshll.u32 %s1714_s9, 7 }
   0xe   : > { %935 = vset.pattern.permute.xlu2 %v1064_v0  ;;  %s201_s16 = scalar_lea.vmem %s1673_s1, %s900_s13  ;;  %s1109_s20 = scalar_lea.vmem %s1672_s0, %s905_s17 }
   0xf   : > { %v936_v1 = vld [vmem:[%s201_s16 + $0x2] ss:$0 sm:$0xff]  ;;  %v937_v2 = vld [vmem:[%s201_s16] ss:$0 sm:$0xff]  ;;  %v942_v3 = vld [vmem:[%s201_s16 + $0x4] ss:$0 sm:$0xff] }
  0x10   : > { %264 = vperm.xlu1 %934, %v936_v1   ;;  %256 = vperm.xlu0 %933, %v937_v2   ;;  %v938_v4 = vld [vmem:[%s201_s16 + $0x3] ss:$0 sm:$0xff]  ;;  %v939_v5 = vld [vmem:[%s201_s16 + $0x1] ss:$0 sm:$0xff]  ;;  %v943_v6 = vld [vmem:[%s201_s16 + $0x5] ss:$0 sm:$0xff] }
  0x11   : > { %272 = vperm.xlu2 %935, %v942_v3   ;;  %v940_v7 = vld [vmem:[%s201_s16 + $0x7] ss:$0 sm:$0xff]  ;;  %v941_v8 = vld [vmem:[%s201_s16 + $0x6] ss:$0 sm:$0xff]  ;;  %v216_v10 = vld [vmem:[%s1109_s20 + $0x8] sm:$0xff]  ;;  %s906_s21 = sshll.u32 %s1714_s9, 4 }
  0x12   : > { %v215_v9 = vld [vmem:[%s1109_s20] sm:$0xff]  ;;  %v220_v14 = vld [vmem:[%s1109_s20 + $0x28] sm:$0xff]  ;;  %v217_v19 = vld [vmem:[%s1109_s20 + $0x10] sm:$0xff]  ;;  %s1533_s24 = scalar_lea.vmem %s1674_s2, %s906_s21 }
  0x13   : > { %v218_v20 = vld [vmem:[%s1109_s20 + $0x18] sm:$0xff]  ;;  %v223_v26 = vld [vmem:[%s1109_s20 + $0x40] sm:$0xff]  ;;  %v221_v29 = vld [vmem:[%s1109_s20 + $0x30] sm:$0xff] }
  0x14   : > { %v219_v30 = vld [vmem:[%s1109_s20 + $0x20] sm:$0xff]  ;;  %v224_v36 = vld [vmem:[%s1109_s20 + $0x48] sm:$0xff]  ;;  %v226_v38 = vld [vmem:[%s1109_s20 + $0x58] sm:$0xff] }
  0x15   : > { %v222_v41 = vld [vmem:[%s1109_s20 + $0x38] sm:$0xff]  ;;  %v229_v48 = vld [vmem:[%s1109_s20 + $0x70] sm:$0xff]  ;;  %v227_v50 = vld [vmem:[%s1109_s20 + $0x60] sm:$0xff] }
  0x16   : > { %v225_v52 = vld [vmem:[%s1109_s20 + $0x50] sm:$0xff]  ;;  %v230_v58 = vld [vmem:[%s1109_s20 + $0x78] sm:$0xff]  ;;  %v228_v60 = vld [vmem:[%s1109_s20 + $0x68] sm:$0xff] }
  0x18   : > { %268 = vperm.xlu1 %934, %v938_v4   ;;  %260 = vperm.xlu0 %933, %v939_v5  }
  0x19   : > { %276 = vperm.xlu2 %935, %v943_v6  }
  0x20   : > { %284 = vperm.xlu1 %934, %v940_v7   ;;  %280 = vperm.xlu0 %933, %v941_v8  }
  0x6b   : > { %v273_v22 = vpop.permute.xlu2 %272 }
  0x6c   : > { %v1139_v31 = vmul.f32 %v273_v22, %v223_v26  ;;  %v1154_v42 = vmul.f32 %v273_v22, %v224_v36 }
  0x6e   : > { %v328_v35 = vsel %vm212_vm0, %v1139_v31, -inf  ;;  %v331_v45 = vsel %vm212_vm0, %v1154_v42, -inf }
  0x73   : > { %v277_v37 = vpop.permute.xlu2 %276 }
  0x74   : > { %v1156_v43 = vmul.f32 %v277_v37, %v226_v38  ;;  %v1173_v55 = vmul.f32 %v277_v37, %v225_v52 }
  0x76   : > { %v337_v46 = vsel %vm212_vm0, %v1156_v43, -inf  ;;  %v334_v59 = vsel %vm212_vm0, %v1173_v55, -inf }
  0x82   : > { %v257_v11 = vpop.permute.xlu0 %256  ;;  %v265_v17 = vpop.permute.xlu1 %264 }
  0x83   : > { %v1113_v12 = vmul.f32 %v257_v11, %v215_v9  ;;  %v1115_v13 = vmul.f32 %v257_v11, %v216_v10  ;;  %v1122_v18 = vmul.f32 %v265_v17, %v220_v14  ;;  %v1143_v34 = vmul.f32 %v265_v17, %v219_v30 }
  0x85   : > { %v307_v15 = vsel %vm212_vm0, %v1115_v13, -inf  ;;  %v304_v16 = vsel %vm212_vm0, %v1113_v12, -inf  ;;  %v319_v25 = vsel %vm212_vm0, %v1122_v18, -inf  ;;  %v316_v40 = vsel %vm212_vm0, %v1143_v34, -inf }
  0x86   : > { %308 = vmax.xlane.f32.xlu0 %v307_v15  ;;  %305 = vmax.xlane.f32.xlu2 %v304_v16 }
  0x8a   : > { %v261_v21 = vpop.permute.xlu0 %260  ;;  %v269_v32 = vpop.permute.xlu1 %268 }
  0x8b   : > { %v1126_v23 = vmul.f32 %v261_v21, %v217_v19  ;;  %v1128_v24 = vmul.f32 %v261_v21, %v218_v20  ;;  %v1141_v33 = vmul.f32 %v269_v32, %v221_v29  ;;  %v1158_v44 = vmul.f32 %v269_v32, %v222_v41 }
  0x8d   : > { %v310_v27 = vsel %vm212_vm0, %v1126_v23, -inf  ;;  %v313_v28 = vsel %vm212_vm0, %v1128_v24, -inf  ;;  %v322_v39 = vsel %vm212_vm0, %v1141_v33, -inf  ;;  %v325_v51 = vsel %vm212_vm0, %v1158_v44, -inf }
  0x8e   : > { %311 = vmax.xlane.f32.xlu1 %v310_v27  ;;  %320 = vmax.xlane.f32.xlu0 %v319_v25 }
  0x8f   : > { %314 = vmax.xlane.f32.xlu2 %v313_v28 }
  0x92   : > { %v285_v47 = vpop.permute.xlu1 %284  ;;  %v281_v49 = vpop.permute.xlu0 %280 }
  0x93   : > { %v1169_v53 = vmul.f32 %v285_v47, %v229_v48  ;;  %v1171_v54 = vmul.f32 %v281_v49, %v227_v50  ;;  %v1183_v61 = vmul.f32 %v285_v47, %v230_v58  ;;  %v1185_v62 = vmul.f32 %v281_v49, %v228_v60 }
  0x95   : > { %v340_v56 = vsel %vm212_vm0, %v1171_v54, -inf  ;;  %v346_v57 = vsel %vm212_vm0, %v1169_v53, -inf  ;;  %v349_v63 = vsel %vm212_vm0, %v1183_v61, -inf  ;;  %v343_v0 = vsel %vm212_vm0, %v1185_v62, -inf }
  0x96   : > { %323 = vmax.xlane.f32.xlu1 %v322_v39  ;;  %329 = vmax.xlane.f32.xlu0 %v328_v35 }
  0x97   : > { %317 = vmax.xlane.f32.xlu2 %v316_v40 }
  0x9e   : > { %332 = vmax.xlane.f32.xlu1 %v331_v45  ;;  %338 = vmax.xlane.f32.xlu0 %v337_v46 }
  0x9f   : > { %326 = vmax.xlane.f32.xlu2 %v325_v51 }
  0xa6   : > { %341 = vmax.xlane.f32.xlu1 %v340_v56  ;;  %347 = vmax.xlane.f32.xlu0 %v346_v57 }
  0xa7   : > { %335 = vmax.xlane.f32.xlu2 %v334_v59 }
  0xae   : > { %350 = vmax.xlane.f32.xlu1 %v349_v63 }
  0xaf   : > { %344 = vmax.xlane.f32.xlu2 %v343_v0 }
  0xf9   : > { %v309_v1 = vpop.xlane.xlu0 %308  ;;  %v306_v2 = vpop.xlane.xlu2 %305 }
  0xfa   : > { %v1192_v3 = vsub.f32 %v1115_v13, %v309_v1  ;;  %v1195_v4 = vsub.f32 %v1113_v12, %v306_v2 }
  0xfc   : > { %v370_v5 = vmul.f32 1.442695, %v1192_v3  ;;  %v368_v6 = vmul.f32 1.442695, %v1195_v4 }
  0xfe   : > { %944 = vpow2.f32 %v370_v5 }
  0xff   : > { %946 = vpow2.f32 %v368_v6 }
 0x101   : > { %v312_v7 = vpop.xlane.xlu1 %311  ;;  %v321_v8 = vpop.xlane.xlu0 %320 }
 0x102   : > { %v1200_v9 = vsub.f32 %v1126_v23, %v312_v7  ;;  %v315_v10 = vpop.xlane.xlu2 %314  ;;  %v1209_v14 = vsub.f32 %v1122_v18, %v321_v8 }
 0x103   : > { %v1203_v11 = vsub.f32 %v1128_v24, %v315_v10 }
 0x104   : > { %v1205_v13 = vpop.eup %944  ;;  %v372_v12 = vmul.f32 1.442695, %v1200_v9  ;;  %v378_v20 = vmul.f32 1.442695, %v1209_v14 }
 0x105   : > { %v1211_v15 = vpop.eup %946  ;;  %v374_v16 = vmul.f32 1.442695, %v1203_v11  ;;  %v403_v17 = vsel %vm212_vm0, %v1205_v13, 0.0 }
 0x106   : > { %948 = vpow2.f32 %v372_v12  ;;  %404 = vadd.xlane.f32.xlu0 %v403_v17  ;;  %v400_v19 = vsel %vm212_vm0, %v1211_v15, 0.0 }
 0x107   : > { %401 = vadd.xlane.f32.xlu2 %v400_v19  ;;  %950 = vpow2.f32 %v374_v16 }
 0x108   : > { %952 = vpow2.f32 %v378_v20 }
 0x109   : > { %v324_v21 = vpop.xlane.xlu1 %323  ;;  %v330_v22 = vpop.xlane.xlu0 %329 }
 0x10a   : > { %v1220_v18 = vsub.f32 %v1141_v33, %v324_v21  ;;  %v318_v23 = vpop.xlane.xlu2 %317  ;;  %v1229_v27 = vsub.f32 %v1139_v31, %v330_v22 }
 0x10b   : > { %v1223_v24 = vsub.f32 %v1143_v34, %v318_v23 }
 0x10c   : > { %v1225_v25 = vpop.eup %948  ;;  %v380_v26 = vmul.f32 1.442695, %v1220_v18  ;;  %v384_v33 = vmul.f32 1.442695, %v1229_v27 }
 0x10d   : > { %v376_v28 = vmul.f32 1.442695, %v1223_v24  ;;  %v406_v29 = vsel %vm212_vm0, %v1225_v25, 0.0  ;;  %v1234_v30 = vpop.eup %950 }
 0x10e   : > { %954 = vpow2.f32 %v380_v26  ;;  %407 = vadd.xlane.f32.xlu1 %v406_v29  ;;  %v409_v32 = vsel %vm212_vm0, %v1234_v30, 0.0  ;;  %v1239_v31 = vpop.eup %952 }
 0x10f   : > { %956 = vpow2.f32 %v376_v28  ;;  %410 = vadd.xlane.f32.xlu2 %v409_v32  ;;  %v415_v46 = vsel %vm212_vm0, %v1239_v31, 0.0 }
 0x110   : > { %958 = vpow2.f32 %v384_v33 }
 0x111   : > { %v333_v34 = vpop.xlane.xlu1 %332  ;;  %v339_v35 = vpop.xlane.xlu0 %338 }
 0x112   : > { %v1242_v36 = vsub.f32 %v1154_v42, %v333_v34  ;;  %v327_v37 = vpop.xlane.xlu2 %326  ;;  %v1251_v41 = vsub.f32 %v1156_v43, %v339_v35 }
 0x113   : > { %v1245_v38 = vsub.f32 %v1158_v44, %v327_v37 }
 0x114   : > { %v1247_v39 = vpop.eup %954  ;;  %v386_v40 = vmul.f32 1.442695, %v1242_v36  ;;  %v390_v48 = vmul.f32 1.442695, %v1251_v41 }
 0x115   : > { %v382_v45 = vmul.f32 1.442695, %v1245_v38  ;;  %v418_v42 = vsel %vm212_vm0, %v1247_v39, 0.0  ;;  %v1258_v47 = vpop.eup %956 }
 0x116   : > { %960 = vpow2.f32 %v386_v40  ;;  %416 = vadd.xlane.f32.xlu1 %v415_v46  ;;  %v412_v44 = vsel %vm212_vm0, %v1258_v47, 0.0  ;;  %v1263_v50 = vpop.eup %958 }
 0x117   : > { %962 = vpow2.f32 %v382_v45  ;;  %419 = vadd.xlane.f32.xlu2 %v418_v42  ;;  %413 = vadd.xlane.f32.xlu0 %v412_v44  ;;  %v424_v63 = vsel %vm212_vm0, %v1263_v50, 0.0 }
 0x118   : > { %964 = vpow2.f32 %v390_v48 }
 0x119   : > { %v342_v43 = vpop.xlane.xlu1 %341  ;;  %v348_v49 = vpop.xlane.xlu0 %347 }
 0x11a   : > { %v1266_v51 = vsub.f32 %v1171_v54, %v342_v43  ;;  %v336_v52 = vpop.xlane.xlu2 %335  ;;  %v1275_v59 = vsub.f32 %v1169_v53, %v348_v49 }
 0x11b   : > { %v1269_v56 = vsub.f32 %v1173_v55, %v336_v52 }
 0x11c   : > { %v1271_v57 = vpop.eup %960  ;;  %v392_v58 = vmul.f32 1.442695, %v1266_v51  ;;  %v396_v1 = vmul.f32 1.442695, %v1275_v59 }
 0x11d   : > { %v388_v60 = vmul.f32 1.442695, %v1269_v56  ;;  %v427_v54 = vsel %vm212_vm0, %v1271_v57, 0.0  ;;  %v1282_v0 = vpop.eup %962 }
 0x11e   : > { %966 = vpow2.f32 %v392_v58  ;;  %425 = vadd.xlane.f32.xlu1 %v424_v63  ;;  %v421_v55 = vsel %vm212_vm0, %v1282_v0, 0.0  ;;  %v1287_v2 = vpop.eup %964 }
 0x11f   : > { %968 = vpow2.f32 %v388_v60  ;;  %428 = vadd.xlane.f32.xlu2 %v427_v54  ;;  %422 = vadd.xlane.f32.xlu0 %v421_v55  ;;  %v433_v16 = vsel %vm212_vm0, %v1287_v2, 0.0 }
 0x120   : > { %970 = vpow2.f32 %v396_v1 }
 0x121   : > { %v351_v53 = vpop.xlane.xlu1 %350 }
 0x122   : > { %v1290_v5 = vsub.f32 %v1183_v61, %v351_v53  ;;  %v345_v6 = vpop.xlane.xlu2 %344 }
 0x123   : > { %v1293_v7 = vsub.f32 %v1185_v62, %v345_v6 }
 0x124   : > { %v1295_v8 = vpop.eup %966  ;;  %v398_v10 = vmul.f32 1.442695, %v1290_v5 }
 0x125   : > { %v394_v12 = vmul.f32 1.442695, %v1293_v7  ;;  %v436_v17 = vsel %vm212_vm0, %v1295_v8, 0.0  ;;  %v1303_v19 = vpop.eup %968 }
 0x126   : > { %972 = vpow2.f32 %v398_v10  ;;  %434 = vadd.xlane.f32.xlu1 %v433_v16  ;;  %v430_v61 = vsel %vm212_vm0, %v1303_v19, 0.0  ;;  %v1307_v62 = vpop.eup %970 }
 0x127   : > { %974 = vpow2.f32 %v394_v12  ;;  %437 = vadd.xlane.f32.xlu2 %v436_v17  ;;  %431 = vadd.xlane.f32.xlu0 %v430_v61  ;;  %v442_v22 = vsel %vm212_vm0, %v1307_v62, 0.0 }
 0x12c   : > { %v1309_v20 = vpop.eup %972 }
 0x12d   : > { %v1311_v21 = vpop.eup %974  ;;  %v445_v23 = vsel %vm212_vm0, %v1309_v20, 0.0 }
 0x12e   : > { %443 = vadd.xlane.f32.xlu1 %v442_v22  ;;  %v439_v26 = vsel %vm212_vm0, %v1311_v21, 0.0 }
 0x12f   : > { %446 = vadd.xlane.f32.xlu2 %v445_v23  ;;  %440 = vadd.xlane.f32.xlu0 %v439_v26 }
 0x179   : > { %v405_v28 = vpop.xlane.xlu0 %404 }
 0x17a   : > { %976 = vrcp.f32 %v405_v28  ;;  %v402_v29 = vpop.xlane.xlu2 %401  ;;  %v472_v46 = vand.u32 2147483647, %v405_v28  ;;  %v474_v42 = vand.u32 2147483648, %v405_v28  ;;  %vm468_vm2 = vweird.f32 %v405_v28 }
 0x17b   : > { %978 = vrcp.f32 %v402_v29  ;;  %v457_v43 = vand.u32 2147483647, %v402_v29  ;;  %v459_v52 = vand.u32 2147483648, %v402_v29  ;;  %vm453_vm4 = vweird.f32 %v402_v29 }
 0x17c   : > { %980 = vlog2.f32 %v405_v28  ;;  %vm1326_vm3 = vcmp.eq.f32.partialorder %v472_v46, 8.507059e+37  ;;  %v475_v1 = vor.u32 1.1754944e-38, %v474_v42 }
 0x17d   : > { %vm1330_vm5 = vcmp.eq.f32.partialorder %v457_v43, 8.507059e+37  ;;  %v460_v17 = vor.u32 1.1754944e-38, %v459_v52 }
 0x180   : > { %v977_v32 = vpop.eup %976 }
 0x181   : > { %v464_v33 = vmul.f32 %v977_v32, %v405_v28  ;;  %v408_v34 = vpop.xlane.xlu1 %407  ;;  %v1319_v35 = vpop.eup %978  ;;  %vm469_vm1 = vweird.f32 %v977_v32 }
 0x182   : > { %982 = vrcp.f32 %v408_v34  ;;  %v449_v40 = vmul.f32 %v1319_v35, %v402_v29  ;;  %v1322_v45 = vpop.xlane.xlu2 %410  ;;  %v981_v49 = vpop.eup %980  ;;  %vm1336_vm6 = vmor %vm468_vm2, %vm469_vm1  ;;  %vm454_vm7 = vweird.f32 %v1319_v35  ;;  %v487_v61 = vand.u32 2147483647, %v408_v34 }
 0x183   : > { %v465_v37 = vsub.f32 1.0, %v464_v33  ;;  %984 = vlog2.f32 %v402_v29  ;;  %v691_v53 = vmul.f32 0.6931472, %v981_v49  ;;  %vm483_vm8 = vweird.f32 %v408_v34  ;;  %vm1357_vm10 = vmor %vm453_vm4, %vm454_vm7 }
 0x184   : > { %v450_v48 = vsub.f32 1.0, %v449_v40  ;;  %986 = vrcp.f32 %v1322_v45  ;;  %v502_v49 = vand.u32 2147483647, %v1322_v45  ;;  %v504_v52 = vand.u32 2147483648, %v1322_v45 }
 0x185   : > { %v466_v44 = vmul.f32 %v977_v32, %v465_v37  ;;  %v489_v37 = vand.u32 2147483648, %v408_v34  ;;  %v739_v42 = vsub.f32 %v691_v53, %v1192_v3  ;;  %vm1366_vm11 = vcmp.eq.f32.partialorder %v487_v61, 8.507059e+37 }
 0x186   : > { %v451_v60 = vmul.f32 %v1319_v35, %v450_v48  ;;  %vm498_vm14 = vweird.f32 %v1322_v45  ;;  %vm1389_vm15 = vcmp.eq.f32.partialorder %v502_v49, 8.507059e+37 }
 0x187   : > { %v467_v58 = vadd.f32 %v977_v32, %v466_v44 }
 0x188   : > { %v983_v63 = vpop.eup %982  ;;  %v452_v26 = vadd.f32 %v1319_v35, %v451_v60 }
 0x189   : > { %v985_v55 = vpop.eup %984  ;;  %v479_v10 = vmul.f32 %v983_v63, %v408_v34  ;;  %v1334_v12 = vpop.xlane.xlu1 %416  ;;  %v471_v23 = vsel %vm1336_vm6, %v977_v32, %v467_v58  ;;  %vm484_vm9 = vweird.f32 %v983_v63 }
 0x18a   : > { %988 = vrcp.f32 %v1334_v12  ;;  %v987_v22 = vpop.eup %986  ;;  %v1345_v33 = vmul.f32 0.6931472, %v985_v55  ;;  %v1349_v46 = vpop.xlane.xlu0 %413  ;;  %v476_v32 = vsel %vm1326_vm3, %v475_v1, %v471_v23  ;;  %v456_v3 = vsel %vm1357_vm10, %v1319_v35, %v452_v26  ;;  %vm1375_vm12 = vmor %vm483_vm8, %vm484_vm9 }
 0x18b   : > { %v480_v28 = vsub.f32 1.0, %v479_v10  ;;  %990 = vlog2.f32 %v408_v34  ;;  %v494_v40 = vmul.f32 %v987_v22, %v1322_v45  ;;  %v490_v55 = vor.u32 1.1754944e-38, %v489_v37  ;;  %v1385_v61 = vpop.xlane.xlu2 %419 }
 0x18c   : > { %992 = vlog2.f32 %v1322_v45  ;;  %v738_v60 = vsub.f32 %v1345_v33, %v1195_v4  ;;  %vm499_vm13 = vweird.f32 %v987_v22  ;;  %v723_v53 = vmul.f32 %v1205_v13, %v476_v32 }
 0x18d   : > { %v481_v44 = vmul.f32 %v983_v63, %v480_v28  ;;  %v495_v43 = vsub.f32 1.0, %v494_v40  ;;  %994 = vrcp.f32 %v1349_v46  ;;  %v461_v23 = vsel %vm1330_vm5, %v460_v17, %v456_v3  ;;  %vm500_vm1 = vmor %vm498_vm14, %vm499_vm13 }
 0x18e   : > { %v505_v13 = vor.u32 1.1754944e-38, %v504_v52  ;;  %vm528_vm2 = vweird.f32 %v1334_v12  ;;  %996 = vlog2.f32 %v1334_v12  ;;  %v532_v6 = vand.u32 2147483647, %v1334_v12 }
 0x18f   : > { %v482_v34 = vadd.f32 %v983_v63, %v481_v44  ;;  %v496_v1 = vmul.f32 %v987_v22, %v495_v43  ;;  %998 = vrcp.f32 %v1385_v61  ;;  %v755_v40 = vmul.f32 %v739_v42, %v723_v53 }
 0x190   : > { %v1371_v29 = vpop.eup %988  ;;  %v722_v44 = vmul.f32 %v1211_v15, %v461_v23  ;;  %v534_v3 = vand.u32 2147483648, %v1334_v12  ;;  %v517_v42 = vand.u32 2147483647, %v1349_v46  ;;  %1000 = vlog2.f32 %v1349_v46 }
 0x191   : > { %v991_v35 = vpop.eup %990  ;;  %v486_v10 = vsel %vm1375_vm12, %v983_v63, %v482_v34  ;;  %v524_v16 = vmul.f32 %v1371_v29, %v1334_v12  ;;  %v497_v26 = vadd.f32 %v987_v22, %v496_v1  ;;  %vm529_vm3 = vweird.f32 %v1371_v29 }
 0x192   : > { %v993_v4 = vpop.eup %992  ;;  %v491_v63 = vsel %vm1366_vm11, %v490_v55, %v486_v10  ;;  %v693_v33 = vmul.f32 0.6931472, %v991_v35  ;;  %vm1411_vm4 = vcmp.eq.f32.partialorder %v532_v6, 8.507059e+37  ;;  %v519_v58 = vand.u32 2147483648, %v1349_v46  ;;  %vm1423_vm5 = vmor %vm528_vm2, %vm529_vm3  ;;  %v1427_v10 = vpop.xlane.xlu1 %425 }
 0x193   : > { %v525_v45 = vsub.f32 1.0, %v524_v16  ;;  %v501_v37 = vsel %vm500_vm1, %v987_v22, %v497_v26  ;;  %v995_v17 = vpop.eup %994  ;;  %v695_v32 = vmul.f32 0.6931472, %v993_v4  ;;  %v724_v43 = vmul.f32 %v1225_v25, %v491_v63  ;;  %v1438_v26 = vpop.xlane.xlu0 %422 }
 0x194   : > { %v506_v49 = vsel %vm1389_vm15, %v505_v13, %v501_v37  ;;  %v509_v22 = vmul.f32 %v995_v17, %v1349_v46  ;;  %v740_v15 = vsub.f32 %v693_v33, %v1200_v9  ;;  %v997_v54 = vpop.eup %996  ;;  %v785_v55 = vsel %vm212_vm0, %v755_v40, 0.0 }
 0x195   : > { %v526_v48 = vmul.f32 %v1371_v29, %v525_v45  ;;  %v754_v1 = vmul.f32 %v738_v60, %v722_v44  ;;  %v725_v35 = vmul.f32 %v1234_v30, %v506_v49  ;;  %v741_v53 = vsub.f32 %v695_v32, %v1203_v11  ;;  %v999_v16 = vpop.eup %998 }
 0x196   : > { %v510_v25 = vsub.f32 1.0, %v509_v22  ;;  %v756_v4 = vmul.f32 %v740_v15, %v724_v43  ;;  %vm514_vm6 = vweird.f32 %v995_v17  ;;  %v535_v30 = vor.u32 1.1754944e-38, %v534_v3  ;;  %v1001_v45 = vpop.eup %1000  ;;  %v1450_v43 = vpop.xlane.xlu2 %428 }
 0x197   : > { %v527_v52 = vadd.f32 %v1371_v29, %v526_v48  ;;  %vm513_vm7 = vweird.f32 %v1349_v46  ;;  %vm1433_vm8 = vcmp.eq.f32.partialorder %v517_v42, 8.507059e+37  ;;  %v539_v12 = vmul.f32 %v999_v16, %v1385_v61 }
 0x198   : > { %v511_v23 = vmul.f32 %v995_v17, %v510_v25  ;;  %v699_v28 = vmul.f32 0.6931472, %v997_v54  ;;  %v520_v63 = vor.u32 1.1754944e-38, %v519_v58  ;;  %1002 = vrcp.f32 %v1427_v10  ;;  %vm515_vm9 = vmor %vm513_vm7, %vm514_vm6 }
 0x199   : > { %v531_v60 = vsel %vm1423_vm5, %v1371_v29, %v527_v52  ;;  %v757_v29 = vmul.f32 %v741_v53, %v725_v35  ;;  %v540_v46 = vsub.f32 1.0, %v539_v12  ;;  %1004 = vlog2.f32 %v1385_v61 }
 0x19a   : > { %v512_v13 = vadd.f32 %v995_v17, %v511_v23  ;;  %v536_v33 = vsel %vm1411_vm4, %v535_v30, %v531_v60  ;;  %v771_v37 = vsel %vm212_vm0, %v756_v4, 0.0  ;;  %v547_v40 = vand.u32 2147483647, %v1385_v61  ;;  %v1468_v30 = vpop.xlane.xlu1 %434 }
 0x19b   : > { %1006 = vrcp.f32 %v1438_v26  ;;  %v541_v32 = vmul.f32 %v999_v16, %v540_v46  ;;  %vm544_vm10 = vweird.f32 %v999_v16  ;;  %v549_v48 = vand.u32 2147483648, %v1385_v61 }
 0x19c   : > { %v516_v6 = vsel %vm515_vm9, %v995_v17, %v512_v13  ;;  %v770_v49 = vsel %vm212_vm0, %v754_v1, 0.0  ;;  %v727_v22 = vmul.f32 %v1239_v31, %v536_v33  ;;  %v697_v52 = vmul.f32 0.6931472, %v1001_v45 }
 0x19d   : > { %v521_v44 = vsel %vm1433_vm8, %v520_v63, %v516_v6  ;;  %vm543_vm11 = vweird.f32 %v1385_v61  ;;  %v1455_v17 = vadd.f32 %v771_v37, %v770_v49  ;;  %v786_v3 = vsel %vm212_vm0, %v757_v29, 0.0 }
 0x19e   : > { %v743_v42 = vsub.f32 %v699_v28, %v1209_v14  ;;  %v542_v15 = vadd.f32 %v999_v16, %v541_v32  ;;  %v1003_v34 = vpop.eup %1002  ;;  %v726_v25 = vmul.f32 %v1258_v47, %v521_v44  ;;  %vm545_vm12 = vmor %vm543_vm11, %vm544_vm10  ;;  %vm548_vm13 = vcmp.eq.f32.partialorder %v547_v40, 8.507059e+37 }
 0x19f   : > { %v577_v58 = vand.u32 2147483647, %v1427_v10  ;;  %1008 = vrcp.f32 %v1450_v43  ;;  %v1005_v31 = vpop.eup %1004  ;;  %v550_v1 = vor.u32 1.1754944e-38, %v549_v48  ;;  %v569_v61 = vmul.f32 %v1003_v34, %v1427_v10 }
 0x1a0   : > { %v546_v54 = vsel %vm545_vm12, %v999_v16, %v542_v15  ;;  %1010 = vlog2.f32 %v1427_v10  ;;  %v787_v53 = vadd.f32 %v786_v3, %v785_v55  ;;  %v759_v14 = vmul.f32 %v743_v42, %v727_v22  ;;  %v1491_v22 = vpop.xlane.xlu0 %431 }
 0x1a1   : > { %v1007_v35 = vpop.eup %1006  ;;  %v742_v9 = vsub.f32 %v697_v52, %v1223_v24  ;;  %vm573_vm14 = vweird.f32 %v1427_v10  ;;  %v551_v47 = vsel %vm548_vm13, %v550_v1, %v546_v54  ;;  %v570_v4 = vsub.f32 1.0, %v569_v61 }
 0x1a2   : > { %v579_v60 = vand.u32 2147483648, %v1427_v10  ;;  %v554_v23 = vmul.f32 %v1007_v35, %v1438_v26  ;;  %v701_v11 = vmul.f32 0.6931472, %v1005_v31  ;;  %vm1470_vm15 = vcmp.eq.f32.partialorder %v577_v58, 8.507059e+37 }
 0x1a3   : > { %v758_v16 = vmul.f32 %v742_v9, %v726_v25  ;;  %vm558_vm1 = vweird.f32 %v1438_v26  ;;  %v571_v55 = vmul.f32 %v1003_v34, %v570_v4  ;;  %vm574_vm2 = vweird.f32 %v1003_v34 }
 0x1a4   : > { %v555_v24 = vsub.f32 1.0, %v554_v23  ;;  %1012 = vlog2.f32 %v1438_v26  ;;  %v788_v13 = vsel %vm212_vm0, %v759_v14, 0.0  ;;  %v728_v63 = vmul.f32 %v1247_v39, %v551_v47  ;;  %vm575_vm4 = vmor %vm573_vm14, %vm574_vm2  ;;  %v1518_v23 = vpop.xlane.xlu2 %437 }
 0x1a5   : > { %v1476_v28 = vpop.eup %1008  ;;  %v564_v45 = vand.u32 2147483648, %v1438_v26  ;;  %1014 = vrcp.f32 %v1468_v30  ;;  %v572_v33 = vadd.f32 %v1003_v34, %v571_v55  ;;  %vm559_vm3 = vweird.f32 %v1007_v35 }
 0x1a6   : > { %v1011_v29 = vpop.eup %1010  ;;  %v556_v46 = vmul.f32 %v1007_v35, %v555_v24  ;;  %v584_v37 = vmul.f32 %v1476_v28, %v1450_v43  ;;  %v773_v6 = vsel %vm212_vm0, %v758_v16, 0.0  ;;  %v744_v40 = vsub.f32 %v701_v11, %v1220_v18  ;;  %vm560_vm5 = vmor %vm558_vm1, %vm559_vm3 }
 0x1a7   : > { %v580_v39 = vor.u32 1.1754944e-38, %v579_v60  ;;  %v562_v44 = vand.u32 2147483647, %v1438_v26  ;;  %v576_v32 = vsel %vm575_vm4, %v1003_v34, %v572_v33  ;;  %1016 = vlog2.f32 %v1450_v43 }
 0x1a8   : > { %v557_v48 = vadd.f32 %v1007_v35, %v556_v46  ;;  %v585_v49 = vsub.f32 1.0, %v584_v37  ;;  %v705_v3 = vmul.f32 0.6931472, %v1011_v29  ;;  %v592_v18 = vand.u32 2147483647, %v1450_v43  ;;  %v1550_v46 = vpop.xlane.xlu1 %443 }
 0x1a9   : > { %v581_v52 = vsel %vm1470_vm15, %v580_v39, %v576_v32  ;;  %v594_v10 = vand.u32 2147483648, %v1450_v43  ;;  %v1499_v15 = vadd.f32 %v788_v13, %v787_v53  ;;  %v760_v34 = vmul.f32 %v744_v40, %v728_v63 }
 0x1aa   : > { %v1013_v42 = vpop.eup %1012  ;;  %v561_v25 = vsel %vm560_vm5, %v1007_v35, %v557_v48  ;;  %v565_v58 = vor.u32 1.1754944e-38, %v564_v45  ;;  %v730_v54 = vmul.f32 %v1263_v50, %v581_v52  ;;  %vm563_vm6 = vcmp.eq.f32.partialorder %v562_v44, 8.507059e+37 }
 0x1ab   : > { %v1501_v31 = vpop.eup %1014  ;;  %v586_v1 = vmul.f32 %v1476_v28, %v585_v49  ;;  %1018 = vrcp.f32 %v1491_v22  ;;  %v774_v26 = vadd.f32 %v773_v6, %v1455_v17  ;;  %vm588_vm7 = vweird.f32 %v1450_v43 }
 0x1ac   : > { %v566_v61 = vsel %vm563_vm6, %v565_v58, %v561_v25  ;;  %v614_v53 = vmul.f32 %v1501_v31, %v1468_v30  ;;  %v746_v35 = vsub.f32 %v705_v3, %v1229_v27  ;;  %v703_v14 = vmul.f32 0.6931472, %v1013_v42 }
 0x1ad   : > { %vm1511_vm8 = vcmp.eq.f32.partialorder %v592_v18, 8.507059e+37  ;;  %v595_v50 = vor.u32 1.1754944e-38, %v594_v10  ;;  %v1017_v47 = vpop.eup %1016  ;;  %v775_v4 = vsel %vm212_vm0, %v760_v34, 0.0  ;;  %vm589_vm9 = vweird.f32 %v1476_v28 }
 0x1ae   : > { %v615_v17 = vsub.f32 1.0, %v614_v53  ;;  %v622_v60 = vand.u32 2147483647, %v1468_v30  ;;  %v762_v16 = vmul.f32 %v746_v35, %v730_v54  ;;  %v729_v27 = vmul.f32 %v1282_v0, %v566_v61  ;;  %vm1539_vm11 = vmor %vm588_vm7, %vm589_vm9 }
 0x1af   : > { %v587_v11 = vadd.f32 %v1476_v28, %v586_v1  ;;  %1020 = vlog2.f32 %v1491_v22  ;;  %v776_v12 = vadd.f32 %v775_v4, %v774_v26  ;;  %vm618_vm10 = vweird.f32 %v1468_v30 }
 0x1b0   : > { %v616_v55 = vmul.f32 %v1501_v31, %v615_v17  ;;  %1022 = vlog2.f32 %v1468_v30  ;;  %v745_v13 = vsub.f32 %v703_v14, %v1245_v38  ;;  %v707_v63 = vmul.f32 0.6931472, %v1017_v47 }
 0x1b1   : > { %v1019_v24 = vpop.eup %1018  ;;  %v624_v45 = vand.u32 2147483648, %v1468_v30  ;;  %1024 = vrcp.f32 %v1518_v23  ;;  %vm619_vm12 = vweird.f32 %v1501_v31  ;;  %vm1544_vm13 = vcmp.eq.f32.partialorder %v622_v60, 8.507059e+37 }
 0x1b2   : > { %v599_v29 = vmul.f32 %v1019_v24, %v1491_v22  ;;  %v607_v33 = vand.u32 2147483647, %v1491_v22  ;;  %v777_v37 = vsel %vm212_vm0, %v762_v16, 0.0  ;;  %v761_v43 = vmul.f32 %v745_v13, %v729_v27  ;;  %vm1581_vm2 = vmor %vm618_vm10, %vm619_vm12 }
 0x1b3   : > { %v591_v6 = vsel %vm1539_vm11, %v1476_v28, %v587_v11  ;;  %v609_v40 = vand.u32 2147483648, %v1491_v22  ;;  %v617_v39 = vadd.f32 %v1501_v31, %v616_v55  ;;  %1026 = vlog2.f32 %v1518_v23  ;;  %v1610_v11 = vpop.xlane.xlu2 %446 }
 0x1b4   : > { %v600_v44 = vsub.f32 1.0, %v599_v29  ;;  %v747_v48 = vsub.f32 %v707_v63, %v1242_v36  ;;  %v625_v49 = vor.u32 1.1754944e-38, %v624_v45  ;;  %vm603_vm14 = vweird.f32 %v1491_v22  ;;  %v1572_v36 = vpop.xlane.xlu0 %440 }
 0x1b5   : > { %v1021_v32 = vpop.eup %1020  ;;  %v1065_v52 = vmov 0.0   ;;  %1028 = vrcp.f32 %v1550_v46  ;;  %v596_v3 = vsel %vm1511_vm8, %v595_v50, %v591_v6  ;;  %vm604_vm15 = vweird.f32 %v1019_v24 }
 0x1b6   : > { %213 = vst.msk [vmem:[%s1533_s24] sm:$0xff] %vm212_vm0, %v1065_v52  ;;  %v1023_v28 = vpop.eup %1022  ;;  %v601_v18 = vmul.f32 %v1019_v24, %v600_v44  ;;  %vm1566_vm1 = vcmp.eq.f32.partialorder %v607_v33, 8.507059e+37  ;;  %v1574_v34 = vadd.f32 %v777_v37, %v776_v12  ;;  %v790_v25 = vsel %vm212_vm0, %v761_v43, 0.0  ;;  %vm605_vm3 = vmor %vm603_vm14, %vm604_vm15 }
 0x1b7   : > { %214 = vst.msk [vmem:[%s1533_s24 + $0x8] sm:$0xff] %vm212_vm0, %v1065_v52  ;;  %v1025_v42 = vpop.eup %1024  ;;  %v610_v54 = vor.u32 1.1754944e-38, %v609_v40  ;;  %v709_v1 = vmul.f32 0.6931472, %v1021_v32  ;;  %v621_v26 = vsel %vm1581_vm2, %v1501_v31, %v617_v39  ;;  %1030 = vlog2.f32 %v1550_v46 }
 0x1b8   : > { %v602_v61 = vadd.f32 %v1019_v24, %v601_v18  ;;  %v629_v53 = vmul.f32 %v1025_v42, %v1518_v23  ;;  %v731_v35 = vmul.f32 %v1271_v57, %v596_v3  ;;  %v1591_v14 = vmul.f32 0.6931472, %v1023_v28 }
 0x1b9   : > { %v637_v30 = vand.u32 2147483647, %v1518_v23  ;;  %1032 = vrcp.f32 %v1572_v36  ;;  %v1027_v9 = vpop.eup %1026  ;;  %v1599_v31 = vadd.f32 %v790_v25, %v1499_v15  ;;  %vm633_vm4 = vweird.f32 %v1518_v23 }
 0x1ba   : > { %v606_v50 = vsel %vm605_vm3, %v1019_v24, %v602_v61  ;;  %v630_v47 = vsub.f32 1.0, %v629_v53  ;;  %v626_v57 = vsel %vm1544_vm13, %v625_v49, %v621_v26  ;;  %v748_v17 = vsub.f32 %v709_v1, %v1269_v56 }
 0x1bb   : > { %v1029_v4 = vpop.eup %1028  ;;  %v611_v22 = vsel %vm1566_vm1, %v610_v54, %v606_v50  ;;  %v639_v60 = vand.u32 2147483648, %v1518_v23  ;;  %vm634_vm5 = vweird.f32 %v1025_v42  ;;  %v1612_v12 = vmul.f32 %v747_v48, %v731_v35 }
 0x1bc   : > { %v732_v16 = vmul.f32 %v1303_v19, %v611_v22  ;;  %v631_v27 = vmul.f32 %v1025_v42, %v630_v47  ;;  %v659_v15 = vmul.f32 %v1029_v4, %v1550_v46  ;;  %v749_v55 = vsub.f32 %v1591_v14, %v1251_v41  ;;  %vm635_vm7 = vmor %vm633_vm4, %vm634_vm5 }
 0x1bd   : > { %vm1616_vm6 = vcmp.eq.f32.partialorder %v637_v30, 8.507059e+37  ;;  %v713_v56 = vmul.f32 0.6931472, %v1027_v9  ;;  %v1031_v13 = vpop.eup %1030  ;;  %1034 = vlog2.f32 %v1572_v36  ;;  %v733_v38 = vmul.f32 %v1287_v2, %v626_v57 }
 0x1be   : > { %v764_v63 = vmul.f32 %v748_v17, %v732_v16  ;;  %v632_v45 = vadd.f32 %v1025_v42, %v631_v27  ;;  %v660_v19 = vsub.f32 1.0, %v659_v15  ;;  %v640_v29 = vor.u32 1.1754944e-38, %v639_v60  ;;  %v720_v27 = vld [vmem:[%s1533_s24] sm:$0xff] }
 0x1bf   : > { %v1033_v0 = vpop.eup %1032  ;;  %v669_v41 = vand.u32 2147483648, %v1550_v46  ;;  %1036 = vrcp.f32 %v1610_v11  ;;  %vm664_vm8 = vweird.f32 %v1029_v4  ;;  %v667_v43 = vand.u32 2147483647, %v1550_v46 }
 0x1c0   : > { %v636_v33 = vsel %vm635_vm7, %v1025_v42, %v632_v45  ;;  %v661_v37 = vmul.f32 %v1029_v4, %v660_v19  ;;  %v750_v40 = vsub.f32 %v713_v56, %v1266_v51  ;;  %vm663_vm9 = vweird.f32 %v1550_v46 }
 0x1c1   : > { %v641_v6 = vsel %vm1616_vm6, %v640_v29, %v636_v33  ;;  %v644_v2 = vmul.f32 %v1033_v0, %v1572_v36  ;;  %v779_v23 = vsel %vm212_vm0, %v764_v63, 0.0  ;;  %v717_v32 = vmul.f32 0.6931472, %v1031_v13  ;;  %vm665_vm10 = vmor %vm663_vm9, %vm664_vm8  ;;  %v721_v33 = vld [vmem:[%s1533_s24 + $0x8] sm:$0xff] }
 0x1c2   : > { %v734_v39 = vmul.f32 %v1295_v8, %v641_v6  ;;  %v662_v44 = vadd.f32 %v1029_v4, %v661_v37  ;;  %v670_v48 = vor.u32 1.1754944e-38, %v669_v41  ;;  %v652_v52 = vand.u32 2147483647, %v1572_v36 }
 0x1c3   : > { %v645_v49 = vsub.f32 1.0, %v644_v2  ;;  %1038 = vlog2.f32 %v1610_v11  ;;  %v1035_v28 = vpop.eup %1034  ;;  %vm668_vm11 = vcmp.eq.f32.partialorder %v667_v43, 8.507059e+37  ;;  %v654_v46 = vand.u32 2147483648, %v1572_v36 }
 0x1c4   : > { %v766_v3 = vmul.f32 %v750_v40, %v734_v39  ;;  %v666_v51 = vsel %vm665_vm10, %v1029_v4, %v662_v44  ;;  %v780_v10 = vadd.f32 %v779_v23, %v1574_v34  ;;  %vm649_vm12 = vweird.f32 %v1033_v0 }
 0x1c5   : > { %v1037_v18 = vpop.eup %1036  ;;  %v671_v42 = vsel %vm668_vm11, %v670_v48, %v666_v51  ;;  %v646_v8 = vmul.f32 %v1033_v0, %v645_v49  ;;  %v752_v58 = vsub.f32 %v717_v32, %v1275_v59  ;;  %vm648_vm13 = vweird.f32 %v1572_v36 }
 0x1c6   : > { %v736_v25 = vmul.f32 %v1307_v62, %v671_v42  ;;  %v674_v54 = vmul.f32 %v1037_v18, %v1610_v11  ;;  %v765_v1 = vmul.f32 %v749_v55, %v733_v38  ;;  %vm653_vm14 = vcmp.eq.f32.partialorder %v652_v52, 8.507059e+37  ;;  %vm650_vm15 = vmor %vm648_vm13, %vm649_vm12 }
 0x1c7   : > { %v647_v26 = vadd.f32 %v1033_v0, %v646_v8  ;;  %v715_v61 = vmul.f32 0.6931472, %v1035_v28  ;;  %v781_v53 = vsel %vm212_vm0, %v766_v3, 0.0  ;;  %v655_v34 = vor.u32 1.1754944e-38, %v654_v46 }
 0x1c8   : > { %v768_v35 = vmul.f32 %v752_v58, %v736_v25  ;;  %v675_v14 = vsub.f32 1.0, %v674_v54  ;;  %v782_v9 = vadd.f32 %v781_v53, %v780_v10  ;;  %v682_v59 = vand.u32 2147483647, %v1610_v11 }
 0x1c9   : > { %v1039_v30 = vpop.eup %1038  ;;  %v651_v62 = vsel %vm650_vm15, %v1033_v0, %v647_v26  ;;  %v684_v36 = vand.u32 2147483648, %v1610_v11  ;;  %vm679_vm1 = vweird.f32 %v1037_v18  ;;  %v792_v57 = vsel %vm212_vm0, %v1612_v12, 0.0 }
 0x1ca   : > { %v783_v50 = vsel %vm212_vm0, %v768_v35, 0.0  ;;  %v656_v47 = vsel %vm653_vm14, %v655_v34, %v651_v62  ;;  %v676_v4 = vmul.f32 %v1037_v18, %v675_v14  ;;  %v751_v60 = vsub.f32 %v715_v61, %v1293_v7 }
 0x1cb   : > { %v784_v22 = vadd.f32 %v783_v50, %v782_v9  ;;  %v735_v17 = vmul.f32 %v1311_v21, %v656_v47  ;;  %v794_v16 = vsel %vm212_vm0, %v765_v1, 0.0  ;;  %vm678_vm2 = vweird.f32 %v1610_v11 }
 0x1cc   : > { %v677_v15 = vadd.f32 %v1037_v18, %v676_v4  ;;  %v719_v55 = vmul.f32 0.6931472, %v1039_v30  ;;  %v793_v24 = vadd.f32 %v792_v57, %v1599_v31  ;;  %vm680_vm3 = vmor %vm678_vm2, %vm679_vm1  ;;  %v685_v12 = vor.u32 1.1754944e-38, %v684_v36 }
 0x1cd   : > { %v800_v56 = vmul.f32 1.442695, %v784_v22  ;;  %v767_v13 = vmul.f32 %v751_v60, %v735_v17  ;;  %vm683_vm4 = vcmp.eq.f32.partialorder %v682_v59, 8.507059e+37 }
 0x1ce   : > { %v681_v63 = vsel %vm680_vm3, %v1037_v18, %v677_v15  ;;  %v795_v7 = vadd.f32 %v794_v16, %v793_v24  ;;  %v753_v11 = vsub.f32 %v719_v55, %v1290_v5 }
 0x1cf   : > { %v802_v21 = vadd.f32 %v800_v56, %v720_v27  ;;  %v796_v45 = vsel %vm212_vm0, %v767_v13, 0.0  ;;  %v686_v19 = vsel %vm683_vm4, %v685_v12, %v681_v63 }
 0x1d0   : > { %v737_v0 = vmul.f32 %v1309_v20, %v686_v19  ;;  %v797_v31 = vadd.f32 %v796_v45, %v795_v7 }
 0x1d1   : > { %804 = vst.msk [vmem:[%s1533_s24] sm:$0xff] %vm212_vm0, %v802_v21 }
 0x1d2   : > { %v769_v38 = vmul.f32 %v753_v11, %v737_v0 }
 0x1d4   : > { %v798_v29 = vsel %vm212_vm0, %v769_v38, 0.0 }
 0x1d5   : > { %v799_v41 = vadd.f32 %v798_v29, %v797_v31 }
 0x1d7   : > { %v801_v37 = vmul.f32 1.442695, %v799_v41 }
 0x1d9   : > { %v803_v43 = vadd.f32 %v801_v37, %v721_v33 }
 0x1db   : > { %805 = vst.msk [vmem:[%s1533_s24 + $0x8] sm:$0xff] %vm212_vm0, %v803_v43 }
 0x1dc PF: > { %s12_s11 = sadd.s32 1, %s1062_s11   ;;  %s1709_s9 = smov %s1058_s10 }
 0x1dd   : > { %p9_p5 = scmp.ge.s32.totalorder %s12_s11, 4   ;;  %s1710_s10 = smov %s1712_s12 }
 0x1df   :  { %11 = sbr.rel (!%p9_p5) target bundleno = 2 (0x2), region = 65 }

// kernel: ebam.7
= control target key start
LH: loop header
LB: loop body
LE: loop exit
PB: predicated region body
PF: predicated region fallthrough
CT: control target
= control target key end

     0   :  { %s477_s12 = smov 0   ;;  %s479_s13 = smov 0   ;;  %s516_s0 = inlined_call_operand.vmem [shape: f32[2,8,256], index: 0, kind: input, shape index: {}]   ;;  %s517_s1 = inlined_call_operand.vmem [shape: f32[2,8,1], index: 1, kind: input, shape index: {}]   ;;  %s518_s2 = inlined_call_operand.vmem [shape: f32[2,1,256], index: 2, kind: input, shape index: {}]   ;;  %s519_s3 = inlined_call_operand.vmem [shape: f32[2,8,256], index: 3, kind: output, shape index: {}]  }
   0x1   :  { %s481_s14 = smov 0  }
   0x2 LB: > { %s25_s15 = sadd.s32 1, %s450_s13  ;;  %p395_p0 = scmp.ge.s32.totalorder %s454_s14, 1  ;;  %s454_s14 = sphi %s481_s14, %s13_s14   ;;  %s450_s13 = sphi %s479_s13, %s521_s13   ;;  %s446_s12 = sphi %s477_s12, %s520_s12  }
   0x3   : > { %p27_p1 = scmp.ge.s32.totalorder %s25_s15, 2  ;;  %p180_p2 = scmp.lt.s32.totalorder %s454_s14, 3 }
   0x5   : > { %s523_s15 = smov (%p27_p1, %s25_s15), 0  ;;  %p181_p3 = pnand %p395_p0, %p180_p2 }
   0x6   : > { %p223_p4 = scmp.lt.s32.totalorder (!%p181_p3), %s446_s12, 1 }
   0x7   : > { %184 = sbr.rel (%p181_p3) target bundleno = 137 (0x89), region = 32 }
   0xc   : > { %v456_v0 = vmov 0   ;;  %s525_s12 = smov (!%p223_p4, %s446_s12), 1 }
   0xd   : > { %431 = vset.pattern.permute.xlu0 %v456_v0  ;;  %s398_s16 = sshll.u32 %s525_s12, 3  ;;  %s399_s20 = sshll.u32 %s525_s12, 1 }
   0xe   : > { %s238_s19 = scalar_lea.vmem %s517_s1, %s398_s16  ;;  %s404_s21 = sshll.u32 %s525_s12, 4 }
   0xf   : > { %v254_v1 = vld [vmem:[%s238_s19] sm:$0xff]  ;;  %s242_s24 = scalar_lea.vmem %s518_s2, %s399_s20  ;;  %s231_s27 = scalar_lea.vmem %s516_s0, %s404_s21 }
  0x10   : > { %257 = vperm.xlu0 %431, %v254_v1   ;;  %v262_v2 = vld [vmem:[%s242_s24] sm:$0x3]  ;;  %v253_v4 = vld [vmem:[%s231_s27 + $0x8] sm:$0xff]  ;;  %s251_s30 = scalar_lea.vmem %s519_s3, %s404_s21 }
  0x11   : > { %v252_v3 = vld [vmem:[%s231_s27] sm:$0xff]  ;;  %v264_v5 = vperm.slane %v262_v2, 0  ;;  %v265_v6 = vperm.slane %v262_v2, 1 }
  0x82   : > { %v258_v7 = vpop.permute.xlu0 %257 }
  0x83   : > { %v260_v8 = vmul.f32 %v258_v7, %v252_v3  ;;  %v261_v9 = vmul.f32 %v258_v7, %v253_v4 }
  0x85   : > { %v268_v10 = vmul.f32 %v264_v5, %v260_v8  ;;  %v269_v11 = vmul.f32 %v265_v6, %v261_v9 }
  0x87   : > { %270 = vst [vmem:[%s251_s30] sm:$0xff] %v268_v10 }
  0x88   : > { %271 = vst [vmem:[%s251_s30 + $0x8] sm:$0xff] %v269_v11 }
  0x89 PF: > { %s13_s14 = sadd.s32 1, %s454_s14   ;;  %s520_s12 = smov %s450_s13 }
  0x8a   : > { %p10_p5 = scmp.ge.s32.totalorder %s13_s14, 4   ;;  %s521_s13 = smov %s523_s15 }
  0x8c   :  { %12 = sbr.rel (!%p10_p5) target bundleno = 2 (0x2), region = 68 }

// kernel: ebam.6
= control target key start
LH: loop header
LB: loop body
LE: loop exit
PB: predicated region body
PF: predicated region fallthrough
CT: control target
= control target key end

     0   :  { %7 = vsyncpa [#allocation3], 0  ;;  %s1377_s9 = smov 0   ;;  %s1773_s0 = inlined_call_operand.vmem [shape: f32[2,22,22], index: 0, kind: input, shape index: {}]   ;;  %s1774_s1 = inlined_call_operand.vmem [shape: f32[50], index: 1, kind: input, shape index: {}]   ;;  %s1775_s2 = inlined_call_operand.vmem [shape: f32[2,16,16], index: 2, kind: output, shape index: {}]  }
   0x1 LB: > { %s1227_s10 = sadd.s32 4294967295, %s1353_s9   ;;  %p1229_p0 = scmp.ge.s32.totalorder %s1353_s9, 1  ;;  %s1353_s9 = sphi %s1377_s9, %s13_s9  }
   0x2   : > { %p91_p1 = scmp.lt.s32.totalorder %s1353_s9, 3  ;;  %s103_s13 = sshll.u32 %s1774_s1, 4  ;;  %s104_s13 = int_to_ptr.vmem [resolvable:$true] %s103_s13 }
   0x3   : > { %p1300_p3 = scmp.eq.s32.totalorder %s1227_s10, 0  ;;  %s1355_s14 = smov [#allocation2]  }
   0x4   : > { %p92_p2 = pnand %p1229_p0, %p91_p1 }
   0x6   : > { %p1296_p4 = pneg %p92_p2  ;;  %124 = sbr.rel (%p92_p2) target bundleno = 390 (0x186), region = 28 }
   0x8   : > { %p1297_p5 = pnand %p1300_p3, %p1296_p4 }
   0xa   : > { %1299 = dma.vmem_to_smem (!%p1297_p5), %s104_s13, 16, %s1355_s14, [#allocation3]  }
   0xb   : > { %1348 = dma.done.wait (%p1300_p3), [#allocation3], 16  }
   0xc   : > { %1350 = vsyncadd (%p1300_p3), [#allocation3], 4294967280 }
   0xd   : > { %131 = sfence }
   0xe   : > { %p148_p6 = scmp.lt.s32.totalorder %s1227_s10, 1  ;;  %s1238_s15 = sld [smem:[#allocation2 + $0x2]]  ;;  %vm259_vm0 = vcmask 1046528   ;;  %vm403_vm1 = vcmask 1045504   ;;  %vm547_vm2 = vcmask 1044480   ;;  %vm691_vm3 = vcmask 1043456  }
   0xf   : > { %s1237_s16 = sld [smem:[#allocation2 + $0x1]]  ;;  %s1356_s22 = smov 126   ;;  %vm835_vm4 = vcmask 1042432   ;;  %vm979_vm5 = vcmask 1041408   ;;  %vm1157_vm7 = vcmask 130048  }
  0x10   : > { %s1777_s10 = smov (!%p148_p6, %s1227_s10), 1  ;;  %s1239_s21 = sld [smem:[#allocation2 + $0x3]] }
  0x11   : > { %s1291_s17 = smul.u32 24, %s1777_s10  ;;  %s1357_s23 = smov 127  }
  0x12   : > { %s1240_s24 = sld [smem:[#allocation2 + $0x4]]  ;;  %s1358_s25 = smov 125  }
  0x13   : > { %s1394_s20 = scalar_lea.vmem %s1773_s0, %s1291_s17  ;;  %s1412_s26 = sld [smem:[#allocation2 + $0x6]] }
  0x14   : > { %v182_v0 = vstv %s1238_s15  ;;  %v1397_v1 = vld [vmem:[%s1394_s20] sm:$0xff]  ;;  %v1404_v5 = vld [vmem:[%s1394_s20 + $0x8] sm:$0xff]  ;;  %s1241_s27 = sld [smem:[#allocation2 + $0x5]]  ;;  %s1359_s29 = smov 124   ;;  %v1422_v16 = vld [vmem:[%s1394_s20 + $0x10] sm:$0x3f] }
  0x15   : > { %v168_v2 = vstv %s1237_s16  ;;  %v183_v3 = vmul.f32 %v182_v0, %v1397_v1  ;;  %v184_v7 = vmul.f32 %v182_v0, %v1404_v5  ;;  %s1244_s28 = sld [smem:[#allocation2 + $0x8]]  ;;  %s1360_s4 = smov 123  }
  0x16   : > { %v169_v4 = vmul.f32 %v168_v2, %v1397_v1  ;;  %v196_v6 = vstv %s1239_s21  ;;  %v170_v8 = vmul.f32 %v168_v2, %v1404_v5  ;;  %s1246_s30 = sld [smem:[#allocation2 + $0xa]]  ;;  %s1361_s5 = smov 122  }
  0x17   : > { %187 = vrot.lane.b32.xlu1 %v183_v3, %s1356_s22  ;;  %v197_v9 = vmul.f32 %v196_v6, %v1397_v1  ;;  %v198_v11 = vmul.f32 %v196_v6, %v1404_v5  ;;  %s1245_s3 = sld [smem:[#allocation2 + $0x9]] }
  0x18   : > { %173 = vrot.lane.b32.xlu0 %v169_v4, %s1357_s23  ;;  %v210_v10 = vstv %s1240_s24  ;;  %s1247_s6 = sld [smem:[#allocation2 + $0xb]] }
  0x19   : > { %201 = vrot.lane.b32.xlu2 %v197_v9, %s1358_s25  ;;  %v212_v12 = vmul.f32 %v210_v10, %v1404_v5  ;;  %v211_v13 = vmul.f32 %v210_v10, %v1397_v1  ;;  %v238_v14 = vstv %s1412_s26  ;;  %s1249_s7 = sld [smem:[#allocation2 + $0xd]] }
  0x1a   : > { %v224_v15 = vstv %s1241_s27  ;;  %v239_v19 = vmul.f32 %v238_v14, %v1397_v1  ;;  %v240_v29 = vmul.f32 %v238_v14, %v1404_v5  ;;  %s1248_s8 = sld [smem:[#allocation2 + $0xc]] }
  0x1b   : > { %v270_v17 = vstv %s1244_s28  ;;  %v225_v18 = vmul.f32 %v224_v15, %v1397_v1  ;;  %v226_v20 = vmul.f32 %v224_v15, %v1404_v5  ;;  %s1251_s11 = sld [smem:[#allocation2 + $0xf]] }
  0x1c   : > { %v272_v21 = vmul.f32 %v270_v17, %v1404_v5  ;;  %v273_v22 = vmul.f32 %v270_v17, %v1422_v16  ;;  %v271_v23 = vmul.f32 %v270_v17, %v1397_v1  ;;  %v312_v27 = vstv %s1246_s30  ;;  %s1253_s12 = sld [smem:[#allocation2 + $0x11]] }
  0x1d   : > { %v291_v28 = vstv %s1245_s3  ;;  %v313_v31 = vmul.f32 %v312_v27, %v1397_v1  ;;  %v314_v32 = vmul.f32 %v312_v27, %v1404_v5  ;;  %v315_v44 = vmul.f32 %v312_v27, %v1422_v16  ;;  %s1252_s13 = sld [smem:[#allocation2 + $0x10]] }
  0x1e   : > { %v278_v24 = vrot.slane %v272_v21, 1  ;;  %v280_v25 = vrot.slane %v273_v22, 1  ;;  %v277_v26 = vrot.slane %v271_v23, 1  ;;  %v292_v30 = vmul.f32 %v291_v28, %v1397_v1  ;;  %s1254_s14 = sld [smem:[#allocation2 + $0x12]] }
  0x1f   : > { %189 = vrot.lane.b32.xlu1 %v184_v7, %s1356_s22  ;;  %v293_v35 = vmul.f32 %v291_v28, %v1404_v5  ;;  %v294_v36 = vmul.f32 %v291_v28, %v1422_v16  ;;  %v319_v38 = vrot.slane %v313_v31, 1  ;;  %v320_v39 = vrot.slane %v314_v32, 1  ;;  %s1256_s15 = sld [smem:[#allocation2 + $0x14]] }
  0x20   : > { %175 = vrot.lane.b32.xlu0 %v170_v8, %s1357_s23  ;;  %v281_v33 = vsel %vm259_vm0, %v278_v24, %v280_v25  ;;  %v279_v34 = vsel %vm259_vm0, %v277_v26, %v278_v24  ;;  %v298_v37 = vrot.slane %v292_v30, 1  ;;  %v333_v42 = vstv %s1247_s6  ;;  %s1255_s16 = sld [smem:[#allocation2 + $0x13]] }
  0x21   : > { %203 = vrot.lane.b32.xlu2 %v198_v11, %s1358_s25  ;;  %v299_v40 = vrot.slane %v293_v35, 1  ;;  %v301_v41 = vrot.slane %v294_v36, 1  ;;  %v335_v45 = vmul.f32 %v333_v42, %v1404_v5  ;;  %v336_v46 = vmul.f32 %v333_v42, %v1422_v16  ;;  %s1258_s17 = sld [smem:[#allocation2 + $0x16]] }
  0x22   : > { %v321_v47 = vsel %vm259_vm0, %v319_v38, %v320_v39  ;;  %v334_v49 = vmul.f32 %v333_v42, %v1397_v1  ;;  %v322_v50 = vrot.slane %v315_v44, 1  ;;  %v375_v54 = vstv %s1249_s7  ;;  %s1260_s18 = sld [smem:[#allocation2 + $0x18]] }
  0x23   : > { %v300_v43 = vsel %vm259_vm0, %v298_v37, %v299_v40  ;;  %v302_v48 = vsel %vm259_vm0, %v299_v40, %v301_v41  ;;  %v341_v51 = vrot.slane %v335_v45, 1  ;;  %v343_v52 = vrot.slane %v336_v46, 1  ;;  %s1259_s19 = sld [smem:[#allocation2 + $0x17]] }
  0x24   : > { %v340_v53 = vrot.slane %v334_v49, 1  ;;  %v354_v55 = vstv %s1248_s8  ;;  %v323_v56 = vsel %vm259_vm0, %v320_v39, %v322_v50  ;;  %v376_v59 = vmul.f32 %v375_v54, %v1397_v1  ;;  %s1261_s21 = sld [smem:[#allocation2 + $0x19]] }
  0x25   : > { %v355_v57 = vmul.f32 %v354_v55, %v1397_v1  ;;  %v344_v58 = vsel %vm259_vm0, %v341_v51, %v343_v52  ;;  %v377_v61 = vmul.f32 %v375_v54, %v1404_v5  ;;  %v356_v62 = vmul.f32 %v354_v55, %v1404_v5  ;;  %s1263_s24 = sld [smem:[#allocation2 + $0x1b]] }
  0x26   : > { %v342_v60 = vsel %vm259_vm0, %v340_v53, %v341_v51  ;;  %v357_v63 = vmul.f32 %v354_v55, %v1422_v16  ;;  %v382_v2 = vrot.slane %v376_v59, 1  ;;  %v414_v7 = vstv %s1251_s11  ;;  %s1262_s26 = sld [smem:[#allocation2 + $0x1a]] }
  0x27   : > { %217 = vrot.lane.b32.xlu1 %v212_v12, %s1359_s29  ;;  %v361_v0 = vrot.slane %v355_v57, 1  ;;  %v383_v3 = vrot.slane %v377_v61, 1  ;;  %v362_v4 = vrot.slane %v356_v62, 1  ;;  %v378_v9 = vmul.f32 %v375_v54, %v1422_v16  ;;  %s1532_s27 = sld [smem:[#allocation2]] }
  0x28   : > { %215 = vrot.lane.b32.xlu0 %v211_v13, %s1359_s29  ;;  %v364_v6 = vrot.slane %v357_v63, 1  ;;  %v416_v10 = vmul.f32 %v414_v7, %v1404_v5  ;;  %v417_v11 = vmul.f32 %v414_v7, %v1422_v16  ;;  %v415_v14 = vmul.f32 %v414_v7, %v1397_v1  ;;  %s1265_s28 = sld [smem:[#allocation2 + $0x1d]] }
  0x29   : > { %229 = vrot.lane.b32.xlu2 %v225_v18, %s1360_s4  ;;  %v363_v8 = vsel %vm259_vm0, %v361_v0, %v362_v4  ;;  %v384_v12 = vsel %vm259_vm0, %v382_v2, %v383_v3  ;;  %v385_v15 = vrot.slane %v378_v9, 1  ;;  %v435_v21 = vstv %s1252_s13  ;;  %s1267_s30 = sld [smem:[#allocation2 + $0x1f]] }
  0x2a   : > { %v365_v13 = vsel %vm259_vm0, %v362_v4, %v364_v6  ;;  %v422_v17 = vrot.slane %v416_v10, 2  ;;  %v424_v18 = vrot.slane %v417_v11, 2  ;;  %v436_v23 = vmul.f32 %v435_v21, %v1397_v1  ;;  %s1266_s3 = sld [smem:[#allocation2 + $0x1e]] }
  0x2b   : > { %v386_v22 = vsel %vm259_vm0, %v383_v3, %v385_v15  ;;  %v437_v28 = vmul.f32 %v435_v21, %v1404_v5  ;;  %v477_v35 = vstv %s1254_s14  ;;  %v558_v62 = vstv %s1258_s17  ;;  %s1268_s6 = sld [smem:[#allocation2 + $0x20]] }
  0x2c   : > { %v425_v24 = vsel %vm403_vm1, %v422_v17, %v424_v18  ;;  %v442_v30 = vrot.slane %v436_v23, 2  ;;  %v479_v38 = vmul.f32 %v477_v35, %v1404_v5  ;;  %v480_v39 = vmul.f32 %v477_v35, %v1422_v16  ;;  %s1243_s7 = sld [smem:[#allocation2 + $0x7]] }
  0x2d   : > { %v478_v42 = vmul.f32 %v477_v35, %v1397_v1  ;;  %v560_v2 = vmul.f32 %v558_v62, %v1404_v5  ;;  %v561_v3 = vmul.f32 %v558_v62, %v1422_v16  ;;  %v559_v7 = vmul.f32 %v558_v62, %v1397_v1  ;;  %s1270_s8 = sld [smem:[#allocation2 + $0x22]] }
  0x2e   : > { %v485_v44 = vrot.slane %v479_v38, 2  ;;  %v487_v45 = vrot.slane %v480_v39, 2  ;;  %s1269_s11 = sld [smem:[#allocation2 + $0x21]] }
  0x2f   : > { %243 = vrot.lane.b32.xlu1 %v239_v19, %s1361_s5  ;;  %v421_v19 = vrot.slane %v415_v14, 2  ;;  %v484_v46 = vrot.slane %v478_v42, 2  ;;  %v566_v9 = vrot.slane %v560_v2, 3  ;;  %v568_v10 = vrot.slane %v561_v3, 3  ;;  %s1274_s13 = sld [smem:[#allocation2 + $0x26]] }
  0x30   : > { %231 = vrot.lane.b32.xlu0 %v226_v20, %s1360_s4  ;;  %v456_v20 = vstv %s1253_s12  ;;  %v488_v51 = vsel %vm403_vm1, %v485_v44, %v487_v45  ;;  %v565_v11 = vrot.slane %v559_v7, 3  ;;  %v663_v42 = vstv %s1263_s24  ;;  %s1272_s12 = sld [smem:[#allocation2 + $0x24]] }
  0x31   : > { %245 = vrot.lane.b32.xlu2 %v240_v29, %s1361_s5  ;;  %v457_v25 = vmul.f32 %v456_v20, %v1397_v1  ;;  %v423_v26 = vsel %vm403_vm1, %v421_v19, %v422_v17  ;;  %v458_v27 = vmul.f32 %v456_v20, %v1404_v5  ;;  %v438_v29 = vmul.f32 %v435_v21, %v1422_v16  ;;  %s1273_s14 = sld [smem:[#allocation2 + $0x25]] }
  0x32   : > { %v459_v37 = vmul.f32 %v456_v20, %v1422_v16  ;;  %v486_v53 = vsel %vm403_vm1, %v484_v46, %v485_v44  ;;  %v569_v17 = vsel %vm547_vm2, %v566_v9, %v568_v10  ;;  %v567_v19 = vsel %vm547_vm2, %v565_v11, %v566_v9  ;;  %s1277_s17 = sld [smem:[#allocation2 + $0x29]] }
  0x33   : > { %v463_v31 = vrot.slane %v457_v25, 2  ;;  %v464_v32 = vrot.slane %v458_v27, 2  ;;  %v666_v2 = vmul.f32 %v663_v42, %v1422_v16  ;;  %s1280_s24 = sld [smem:[#allocation2 + $0x2c]] }
  0x35   : > { %v465_v40 = vsel %vm403_vm1, %v463_v31, %v464_v32 }
  0x37   : > { %284 = vrot.lane.b32.xlu1 %v281_v33, %s1357_s23  ;;  %v443_v33 = vrot.slane %v437_v28, 2 }
  0x38   : > { %282 = vrot.lane.b32.xlu0 %v279_v34, %s1357_s23  ;;  %v445_v34 = vrot.slane %v438_v29, 2  ;;  %v621_v29 = vstv %s1261_s21  ;;  %s1281_s21 = sld [smem:[#allocation2 + $0x2d]] }
  0x39   : > { %303 = vrot.lane.b32.xlu2 %v300_v43, %s1356_s22  ;;  %v444_v36 = vsel %vm403_vm1, %v442_v30, %v443_v33  ;;  %v466_v43 = vrot.slane %v459_v37, 2 }
  0x3a   : > { %v446_v41 = vsel %vm403_vm1, %v443_v33, %v445_v34  ;;  %v624_v33 = vmul.f32 %v621_v29, %v1422_v16 }
  0x3b   : > { %v467_v49 = vsel %vm403_vm1, %v464_v32, %v466_v43  ;;  %v623_v32 = vmul.f32 %v621_v29, %v1404_v5  ;;  %v642_v43 = vstv %s1262_s26  ;;  %s1282_s26 = sld [smem:[#allocation2 + $0x2e]] }
  0x3c   : > { %v631_v39 = vrot.slane %v624_v33, 3  ;;  %v643_v45 = vmul.f32 %v642_v43, %v1397_v1 }
  0x3d   : > { %v629_v38 = vrot.slane %v623_v32, 3 }
  0x3f   : > { %324 = vrot.lane.b32.xlu1 %v321_v47, %s1358_s25  ;;  %v519_v47 = vstv %s1256_s15  ;;  %v632_v46 = vsel %vm547_vm2, %v629_v38, %v631_v39  ;;  %v765_v39 = vstv %s1268_s6  ;;  %s1275_s15 = sld [smem:[#allocation2 + $0x27]] }
  0x40   : > { %305 = vrot.lane.b32.xlu0 %v302_v48, %s1356_s22  ;;  %v498_v48 = vstv %s1255_s16  ;;  %v520_v52 = vmul.f32 %v519_v47, %v1397_v1  ;;  %v521_v54 = vmul.f32 %v519_v47, %v1404_v5  ;;  %v522_v0 = vmul.f32 %v519_v47, %v1422_v16  ;;  %s1250_s16 = sld [smem:[#allocation2 + $0xe]] }
  0x41   : > { %326 = vrot.lane.b32.xlu2 %v323_v56, %s1358_s25  ;;  %v499_v50 = vmul.f32 %v498_v48, %v1397_v1  ;;  %v500_v55 = vmul.f32 %v498_v48, %v1404_v5  ;;  %v501_v56 = vmul.f32 %v498_v48, %v1422_v16  ;;  %v162_v47 = vstv %s1532_s27  ;;  %s1257_s27 = sld [smem:[#allocation2 + $0x15]] }
  0x42   : > { %v527_v59 = vrot.slane %v521_v54, 2  ;;  %v664_v48 = vmul.f32 %v663_v42, %v1397_v1  ;;  %v649_v54 = vrot.slane %v643_v45, 3  ;;  %v164_v11 = vmul.f32 %v162_v47, %v1404_v5 }
  0x43   : > { %v505_v57 = vrot.slane %v499_v50, 2  ;;  %v508_v61 = vrot.slane %v501_v56, 2  ;;  %v665_v50 = vmul.f32 %v663_v42, %v1404_v5 }
  0x47   : > { %347 = vrot.lane.b32.xlu1 %v344_v58, %s1359_s29  ;;  %v526_v58 = vrot.slane %v520_v52, 2  ;;  %v645_v52 = vmul.f32 %v642_v43, %v1422_v16 }
  0x48   : > { %345 = vrot.lane.b32.xlu0 %v342_v60, %s1359_s29  ;;  %v506_v60 = vrot.slane %v500_v55, 2  ;;  %v670_v55 = vrot.slane %v664_v48, 3  ;;  %v767_v48 = vmul.f32 %v765_v39, %v1404_v5 }
  0x49   : > { %366 = vrot.lane.b32.xlu2 %v363_v8, %s1360_s4  ;;  %v528_v4 = vsel %vm403_vm1, %v526_v58, %v527_v59  ;;  %v529_v8 = vrot.slane %v522_v0, 2 }
  0x4a   : > { %v507_v63 = vsel %vm403_vm1, %v505_v57, %v506_v60  ;;  %v509_v6 = vsel %vm403_vm1, %v506_v60, %v508_v61  ;;  %v671_v57 = vrot.slane %v665_v50, 3  ;;  %v702_v60 = vstv %s1265_s28  ;;  %s1284_s28 = sld [smem:[#allocation2 + $0x30]] }
  0x4b   : > { %v530_v14 = vsel %vm403_vm1, %v527_v59, %v529_v8  ;;  %v652_v59 = vrot.slane %v645_v52, 3  ;;  %v704_v3 = vmul.f32 %v702_v60, %v1404_v5  ;;  %v703_v9 = vmul.f32 %v702_v60, %v1397_v1 }
  0x4c   : > { %v672_v7 = vsel %vm547_vm2, %v670_v55, %v671_v57  ;;  %v766_v52 = vmul.f32 %v765_v39, %v1397_v1 }
  0x4f   : > { %387 = vrot.lane.b32.xlu1 %v384_v12, %s1361_s5  ;;  %v600_v12 = vstv %s1260_s18  ;;  %s1276_s18 = sld [smem:[#allocation2 + $0x28]] }
  0x50   : > { %368 = vrot.lane.b32.xlu0 %v365_v13, %s1360_s4  ;;  %v579_v13 = vstv %s1259_s19  ;;  %v601_v18 = vmul.f32 %v600_v12, %v1397_v1  ;;  %v602_v20 = vmul.f32 %v600_v12, %v1404_v5  ;;  %v603_v31 = vmul.f32 %v600_v12, %v1422_v16  ;;  %s1279_s19 = sld [smem:[#allocation2 + $0x2b]] }
  0x51   : > { %389 = vrot.lane.b32.xlu2 %v386_v22, %s1361_s5  ;;  %v580_v15 = vmul.f32 %v579_v13, %v1397_v1  ;;  %v581_v21 = vmul.f32 %v579_v13, %v1404_v5  ;;  %v582_v22 = vmul.f32 %v579_v13, %v1422_v16  ;;  %v673_v12 = vrot.slane %v666_v2, 3 }
  0x52   : > { %v610_v37 = vrot.slane %v603_v31, 3  ;;  %v710_v13 = vrot.slane %v704_v3, 4 }
  0x53   : > { %v586_v23 = vrot.slane %v580_v15, 3  ;;  %v587_v27 = vrot.slane %v581_v21, 3  ;;  %v589_v28 = vrot.slane %v582_v22, 3  ;;  %v723_v21 = vstv %s1266_s3 }
  0x54   : > { %v726_v31 = vmul.f32 %v723_v21, %v1422_v16 }
  0x55   : > { %v588_v30 = vsel %vm547_vm2, %v586_v23, %v587_v27  ;;  %v590_v35 = vsel %vm547_vm2, %v587_v27, %v589_v28  ;;  %v674_v23 = vsel %vm547_vm2, %v671_v57, %v673_v12 }
  0x57   : > { %428 = vrot.lane.b32.xlu1 %v425_v24, %s1357_s23  ;;  %v607_v24 = vrot.slane %v601_v18, 3  ;;  %v744_v18 = vstv %s1267_s30  ;;  %s1283_s30 = sld [smem:[#allocation2 + $0x2f]] }
  0x58   : > { %426 = vrot.lane.b32.xlu0 %v423_v26, %s1357_s23  ;;  %v608_v26 = vrot.slane %v602_v20, 3  ;;  %v746_v27 = vmul.f32 %v744_v18, %v1404_v5 }
  0x59   : > { %447 = vrot.lane.b32.xlu2 %v444_v36, %s1356_s22  ;;  %v622_v36 = vmul.f32 %v621_v29, %v1397_v1 }
  0x5a   : > { %v609_v34 = vsel %vm547_vm2, %v607_v24, %v608_v26  ;;  %v611_v44 = vsel %vm547_vm2, %v608_v26, %v610_v37  ;;  %v724_v24 = vmul.f32 %v723_v21, %v1397_v1  ;;  %v745_v26 = vmul.f32 %v744_v18, %v1397_v1 }
  0x5c   : > { %v730_v33 = vrot.slane %v724_v24, 4 }
  0x5f   : > { %468 = vrot.lane.b32.xlu1 %v465_v40, %s1358_s25 }
  0x60   : > { %449 = vrot.lane.b32.xlu0 %v446_v41, %s1356_s22  ;;  %v628_v41 = vrot.slane %v622_v36, 3 }
  0x61   : > { %470 = vrot.lane.b32.xlu2 %v467_v49, %s1358_s25 }
  0x62   : > { %v630_v49 = vsel %vm547_vm2, %v628_v41, %v629_v38  ;;  %v733_v38 = vrot.slane %v726_v31, 4 }
  0x67   : > { %491 = vrot.lane.b32.xlu1 %v488_v51, %s1359_s29  ;;  %v644_v51 = vmul.f32 %v642_v43, %v1404_v5  ;;  %v252_v43 = vstv %s1243_s7 }
  0x68   : > { %489 = vrot.lane.b32.xlu0 %v486_v53, %s1359_s29  ;;  %v163_v53 = vmul.f32 %v162_v47, %v1397_v1  ;;  %v255_v55 = vmul.f32 %v252_v43, %v1422_v16 }
  0x69   : > { %510 = vrot.lane.b32.xlu2 %v507_v63, %s1360_s4  ;;  %v650_v58 = vrot.slane %v644_v51, 3  ;;  %v768_v51 = vmul.f32 %v765_v39, %v1422_v16 }
  0x6b   : > { %v651_v0 = vsel %vm547_vm2, %v649_v54, %v650_v58  ;;  %v653_v8 = vsel %vm547_vm2, %v650_v58, %v652_v59  ;;  %v254_v54 = vmul.f32 %v252_v43, %v1404_v5  ;;  %v775_v59 = vrot.slane %v768_v51, 4 }
  0x6f   : > { %531 = vrot.lane.b32.xlu1 %v528_v4, %s1361_s5  ;;  %v705_v4 = vmul.f32 %v702_v60, %v1422_v16  ;;  %v772_v60 = vrot.slane %v766_v52, 4 }
  0x70   : > { %512 = vrot.lane.b32.xlu0 %v509_v6, %s1360_s4 }
  0x71   : > { %533 = vrot.lane.b32.xlu2 %v530_v14, %s1361_s5  ;;  %v712_v14 = vrot.slane %v705_v4, 4  ;;  %v263_v4 = vrot.slane %v255_v55, 1 }
  0x73   : > { %v202_v25 = vpop.permute.xlu2 %201 }
  0x77   : > { %572 = vrot.lane.b32.xlu1 %v569_v17, %s1357_s23  ;;  %v709_v17 = vrot.slane %v703_v9, 4 }
  0x78   : > { %570 = vrot.lane.b32.xlu0 %v567_v19, %s1357_s23 }
  0x79   : > { %591 = vrot.lane.b32.xlu2 %v588_v30, %s1356_s22  ;;  %v711_v29 = vsel %vm691_vm3, %v709_v17, %v710_v13  ;;  %v725_v30 = vmul.f32 %v723_v21, %v1404_v5 }
  0x7b   : > { %v1540_v40 = vpop.permute.xlu2 %203  ;;  %v731_v37 = vrot.slane %v725_v30, 4 }
  0x7d   : > { %v734_v50 = vsel %vm691_vm3, %v731_v37, %v733_v38 }
  0x7f   : > { %612 = vrot.lane.b32.xlu1 %v609_v34, %s1358_s25  ;;  %v751_v34 = vrot.slane %v745_v26, 4 }
  0x80   : > { %593 = vrot.lane.b32.xlu0 %v590_v35, %s1356_s22  ;;  %v752_v35 = vrot.slane %v746_v27, 4 }
  0x81   : > { %614 = vrot.lane.b32.xlu2 %v611_v44, %s1358_s25 }
  0x82   : > { %v753_v47 = vsel %vm691_vm3, %v751_v34, %v752_v35 }
  0x83   : > { %v1555_v56 = vpop.permute.xlu2 %229 }
  0x87   : > { %635 = vrot.lane.b32.xlu1 %v632_v46, %s1359_s29  ;;  %v747_v46 = vmul.f32 %v744_v18, %v1422_v16 }
  0x88   : > { %633 = vrot.lane.b32.xlu0 %v630_v49, %s1359_s29 }
  0x89   : > { %v188_v61 = vpop.permute.xlu1 %187  ;;  %654 = vrot.lane.b32.xlu2 %v651_v0, %s1360_s4  ;;  %v754_v57 = vrot.slane %v747_v46, 4  ;;  %v261_v0 = vrot.slane %v254_v54, 1 }
  0x8a   : > { %v174_v62 = vpop.permute.xlu0 %173 }
  0x8b   : > { %v179_v63 = vadd.f32 %v174_v62, %v163_v53  ;;  %v1568_v15 = vpop.permute.xlu2 %245  ;;  %v253_v53 = vmul.f32 %v252_v43, %v1397_v1  ;;  %v786_v62 = vstv %s1269_s11 }
  0x8c   : > { %v787_v9 = vmul.f32 %v786_v62, %v1397_v1  ;;  %v788_v12 = vmul.f32 %v786_v62, %v1404_v5  ;;  %v789_v18 = vmul.f32 %v786_v62, %v1422_v16 }
  0x8d   : > { %v193_v6 = vadd.f32 %v188_v61, %v179_v63  ;;  %v807_v61 = vstv %s1270_s8  ;;  %v260_v63 = vrot.slane %v253_v53, 1 }
  0x8e   : > { %v793_v21 = vrot.slane %v787_v9, 4  ;;  %v796_v27 = vrot.slane %v789_v18, 4  ;;  %v810_v34 = vmul.f32 %v807_v61, %v1422_v16 }
  0x8f   : > { %v207_v10 = vadd.f32 %v202_v25, %v193_v6  ;;  %675 = vrot.lane.b32.xlu1 %v672_v7, %s1361_s5  ;;  %v713_v25 = vsel %vm691_vm3, %v710_v13, %v712_v14 }
  0x90   : > { %656 = vrot.lane.b32.xlu0 %v653_v8, %s1360_s4  ;;  %v755_v8 = vsel %vm691_vm3, %v752_v35, %v754_v57  ;;  %v817_v43 = vrot.slane %v810_v34, 4 }
  0x91   : > { %v190_v19 = vpop.permute.xlu1 %189  ;;  %677 = vrot.lane.b32.xlu2 %v674_v23, %s1361_s5 }
  0x92   : > { %v176_v20 = vpop.permute.xlu0 %175 }
  0x93   : > { %v180_v22 = vadd.f32 %v176_v20, %v164_v11  ;;  %v1582_v36 = vpop.permute.xlu2 %303  ;;  %v809_v11 = vmul.f32 %v807_v61, %v1404_v5  ;;  %v264_v20 = vsel %vm259_vm0, %v261_v0, %v263_v4  ;;  %v909_v4 = vstv %s1275_s15 }
  0x95   : > { %v194_v28 = vadd.f32 %v190_v19, %v180_v22  ;;  %v262_v19 = vsel %vm259_vm0, %v260_v63, %v261_v0  ;;  %v815_v23 = vrot.slane %v809_v11, 4 }
  0x97   : > { %v208_v32 = vadd.f32 %v1540_v40, %v194_v28  ;;  %716 = vrot.lane.b32.xlu1 %v713_v25, %s1357_s23  ;;  %v732_v40 = vsel %vm691_vm3, %v730_v33, %v731_v37  ;;  %v846_v28 = vstv %s1272_s12  ;;  %v818_v52 = vsel %vm691_vm3, %v815_v23, %v817_v43 }
  0x98   : > { %714 = vrot.lane.b32.xlu0 %v711_v29, %s1357_s23  ;;  %v848_v35 = vmul.f32 %v846_v28, %v1404_v5  ;;  %v849_v37 = vmul.f32 %v846_v28, %v1422_v16 }
  0x99   : > { %v218_v41 = vpop.permute.xlu1 %217  ;;  %735 = vrot.lane.b32.xlu2 %v732_v40, %s1356_s22 }
  0x9a   : > { %v216_v42 = vpop.permute.xlu0 %215  ;;  %v222_v44 = vadd.f32 %v218_v41, %v208_v32 }
  0x9b   : > { %v221_v45 = vadd.f32 %v216_v42, %v207_v10  ;;  %v1598_v58 = vpop.permute.xlu2 %326  ;;  %v808_v10 = vmul.f32 %v807_v61, %v1397_v1  ;;  %v847_v42 = vmul.f32 %v846_v28, %v1397_v1  ;;  %v951_v28 = vstv %s1277_s17 }
  0x9d   : > { %v235_v49 = vadd.f32 %v1555_v56, %v221_v45  ;;  %v773_v56 = vrot.slane %v767_v48, 4  ;;  %v814_v22 = vrot.slane %v808_v10, 4  ;;  %v856_v45 = vrot.slane %v849_v37, 5 }
  0x9e   : > { %v853_v46 = vrot.slane %v847_v42, 5  ;;  %v953_v42 = vmul.f32 %v951_v28, %v1404_v5 }
  0x9f   : > { %756 = vrot.lane.b32.xlu1 %v753_v47, %s1358_s25  ;;  %v776_v14 = vsel %vm691_vm3, %v773_v56, %v775_v59  ;;  %v774_v17 = vsel %vm691_vm3, %v772_v60, %v773_v56  ;;  %v816_v39 = vsel %vm691_vm3, %v814_v22, %v815_v23 }
  0xa0   : > { %737 = vrot.lane.b32.xlu0 %v734_v50, %s1356_s22 }
  0xa1   : > { %v244_v2 = vpop.permute.xlu1 %243  ;;  %758 = vrot.lane.b32.xlu2 %v755_v8, %s1358_s25  ;;  %v396_v8 = vstv %s1250_s16 }
  0xa2   : > { %v232_v3 = vpop.permute.xlu0 %231  ;;  %v249_v6 = vadd.f32 %v244_v2, %v235_v49  ;;  %v867_v49 = vstv %s1273_s14  ;;  %v399_v22 = vmul.f32 %v396_v8, %v1422_v16  ;;  %v397_v23 = vmul.f32 %v396_v8, %v1397_v1 }
  0xa3   : > { %v236_v7 = vadd.f32 %v232_v3, %v222_v44  ;;  %v1614_v24 = vpop.permute.xlu2 %366  ;;  %v854_v44 = vrot.slane %v848_v35, 5  ;;  %v868_v53 = vmul.f32 %v867_v49, %v1397_v1  ;;  %v869_v60 = vmul.f32 %v867_v49, %v1404_v5 }
  0xa4   : > { %v267_v25 = vadd.f32 %v262_v19, %v249_v6  ;;  %v870_v61 = vmul.f32 %v867_v49, %v1422_v16  ;;  %v912_v19 = vmul.f32 %v909_v4, %v1422_v16  ;;  %v404_v34 = vrot.slane %v397_v23, 2 }
  0xa5   : > { %v250_v13 = vadd.f32 %v1568_v15, %v236_v7  ;;  %v794_v15 = vrot.slane %v788_v12, 4  ;;  %v857_v54 = vsel %vm835_vm4, %v854_v44, %v856_v45  ;;  %v855_v59 = vsel %vm835_vm4, %v853_v46, %v854_v44 }
  0xa6   : > { %v874_v62 = vrot.slane %v868_v53, 5  ;;  %v875_v3 = vrot.slane %v869_v60, 5 }
  0xa7   : > { %779 = vrot.lane.b32.xlu1 %v776_v14, %s1359_s29  ;;  %v268_v26 = vadd.f32 %v264_v20, %v250_v13  ;;  %v795_v33 = vsel %vm691_vm3, %v793_v21, %v794_v15  ;;  %v797_v41 = vsel %vm691_vm3, %v794_v15, %v796_v27  ;;  %v911_v14 = vmul.f32 %v909_v4, %v1404_v5 }
  0xa8   : > { %777 = vrot.lane.b32.xlu0 %v774_v17, %s1359_s29  ;;  %v876_v11 = vsel %vm835_vm4, %v874_v62, %v875_v3  ;;  %v910_v20 = vmul.f32 %v909_v4, %v1397_v1  ;;  %v398_v21 = vmul.f32 %v396_v8, %v1404_v5 }
  0xa9   : > { %v285_v29 = vpop.permute.xlu1 %284  ;;  %798 = vrot.lane.b32.xlu2 %v795_v33, %s1360_s4  ;;  %v407_v33 = vrot.slane %v399_v22, 2 }
  0xaa   : > { %v283_v30 = vpop.permute.xlu0 %282  ;;  %v289_v31 = vadd.f32 %v285_v29, %v268_v26  ;;  %v919_v26 = vrot.slane %v912_v19, 5  ;;  %v916_v27 = vrot.slane %v910_v20, 5  ;;  %v930_v29 = vstv %s1276_s18 }
  0xab   : > { %v288_v32 = vadd.f32 %v283_v30, %v267_v25  ;;  %v1627_v40 = vpop.permute.xlu2 %389  ;;  %v932_v43 = vmul.f32 %v930_v29, %v1404_v5 }
  0xad   : > { %v309_v38 = vadd.f32 %v1582_v36, %v288_v32  ;;  %v888_v36 = vstv %s1274_s13  ;;  %v405_v32 = vrot.slane %v398_v21, 2 }
  0xae   : > { %v889_v55 = vmul.f32 %v888_v36, %v1397_v1  ;;  %v890_v57 = vmul.f32 %v888_v36, %v1404_v5  ;;  %v891_v12 = vmul.f32 %v888_v36, %v1422_v16  ;;  %v933_v36 = vmul.f32 %v930_v29, %v1422_v16 }
  0xaf   : > { %819 = vrot.lane.b32.xlu1 %v816_v39, %s1361_s5  ;;  %v931_v39 = vmul.f32 %v930_v29, %v1397_v1 }
  0xb0   : > { %800 = vrot.lane.b32.xlu0 %v797_v41, %s1360_s4  ;;  %v895_v63 = vrot.slane %v889_v55, 5  ;;  %v896_v0 = vrot.slane %v890_v57, 5  ;;  %v898_v15 = vrot.slane %v891_v12, 5  ;;  %v952_v41 = vmul.f32 %v951_v28, %v1397_v1 }
  0xb1   : > { %v325_v47 = vpop.permute.xlu1 %324  ;;  %821 = vrot.lane.b32.xlu2 %v818_v52, %s1361_s5  ;;  %v937_v49 = vrot.slane %v931_v39, 5  ;;  %v940_v55 = vrot.slane %v933_v36, 5  ;;  %v990_v57 = vstv %s1279_s19 }
  0xb2   : > { %v306_v48 = vpop.permute.xlu0 %305  ;;  %v330_v50 = vadd.f32 %v325_v47, %v309_v38  ;;  %v897_v13 = vsel %vm835_vm4, %v895_v63, %v896_v0  ;;  %v899_v38 = vsel %vm835_vm4, %v896_v0, %v898_v15  ;;  %v408_v47 = vsel %vm403_vm1, %v405_v32, %v407_v33  ;;  %v1693_v15 = vld [vmem:[%s1394_s20] sm:$0xff] }
  0xb3   : > { %v310_v51 = vadd.f32 %v306_v48, %v289_v31  ;;  %v1641_v2 = vpop.permute.xlu2 %447  ;;  %v406_v48 = vsel %vm403_vm1, %v404_v34, %v405_v32  ;;  %v954_v63 = vmul.f32 %v951_v28, %v1422_v16  ;;  %v992_v0 = vmul.f32 %v990_v57, %v1404_v5 }
  0xb4   : > { %v1053_v34 = vstv %s1282_s26 }
  0xb5   : > { %v331_v56 = vadd.f32 %v1598_v58, %v310_v51  ;;  %v877_v58 = vrot.slane %v870_v61, 5  ;;  %v959_v51 = vrot.slane %v953_v42, 5  ;;  %v961_v8 = vrot.slane %v954_v63, 5 }
  0xb7   : > { %860 = vrot.lane.b32.xlu1 %v857_v54, %s1357_s23  ;;  %v878_v18 = vsel %vm835_vm4, %v875_v3, %v877_v58  ;;  %v993_v3 = vmul.f32 %v990_v57, %v1422_v16  ;;  %v991_v58 = vmul.f32 %v990_v57, %v1397_v1  ;;  %v962_v20 = vsel %vm835_vm4, %v959_v51, %v961_v8 }
  0xb8   : > { %858 = vrot.lane.b32.xlu0 %v855_v59, %s1357_s23  ;;  %v1095_v57 = vstv %s1284_s28 }
  0xb9   : > { %v348_v6 = vpop.permute.xlu1 %347  ;;  %879 = vrot.lane.b32.xlu2 %v876_v11, %s1356_s22  ;;  %v997_v11 = vrot.slane %v991_v58, 6 }
  0xba   : > { %v346_v7 = vpop.permute.xlu0 %345  ;;  %v352_v9 = vadd.f32 %v348_v6, %v331_v56 }
  0xbb   : > { %v351_v10 = vadd.f32 %v346_v7, %v330_v50  ;;  %v1657_v25 = vpop.permute.xlu2 %470  ;;  %v958_v50 = vrot.slane %v952_v41, 5 }
  0xbd   : > { %v372_v17 = vadd.f32 %v1614_v24, %v351_v10  ;;  %v917_v24 = vrot.slane %v911_v14, 5  ;;  %v960_v6 = vsel %vm835_vm4, %v958_v50, %v959_v51  ;;  %v1000_v10 = vrot.slane %v993_v3, 6 }
  0xbf   : > { %900 = vrot.lane.b32.xlu1 %v897_v13, %s1358_s25  ;;  %v920_v45 = vsel %vm835_vm4, %v917_v24, %v919_v26  ;;  %v918_v46 = vsel %vm835_vm4, %v916_v27, %v917_v24  ;;  %v1032_v13 = vstv %s1281_s21 }
  0xc0   : > { %881 = vrot.lane.b32.xlu0 %v878_v18, %s1356_s22  ;;  %v1033_v24 = vmul.f32 %v1693_v15, %v1032_v13  ;;  %v1034_v27 = vmul.f32 %v1032_v13, %v1404_v5  ;;  %v1035_v42 = vmul.f32 %v1032_v13, %v1422_v16 }
  0xc1   : > { %v388_v30 = vpop.permute.xlu1 %387  ;;  %902 = vrot.lane.b32.xlu2 %v899_v38, %s1358_s25 }
  0xc2   : > { %v369_v31 = vpop.permute.xlu0 %368  ;;  %v393_v35 = vadd.f32 %v388_v30, %v372_v17  ;;  %v1011_v17 = vstv %s1280_s24  ;;  %v1040_v32 = vrot.slane %v1034_v27, 6 }
  0xc3   : > { %v373_v37 = vadd.f32 %v369_v31, %v352_v9  ;;  %v1673_v52 = vpop.permute.xlu2 %510  ;;  %v998_v9 = vrot.slane %v992_v0, 6  ;;  %v1012_v21 = vmul.f32 %v1011_v17, %v1397_v1  ;;  %v1013_v28 = vmul.f32 %v1011_v17, %v1404_v5 }
  0xc4   : > { %v411_v54 = vadd.f32 %v406_v48, %v393_v35  ;;  %v1014_v29 = vmul.f32 %v1011_v17, %v1422_v16  ;;  %v1039_v1 = vrot.slane %v1033_v24, 6  ;;  %v1054_v48 = vmul.f32 %v1693_v15, %v1053_v34 }
  0xc5   : > { %v394_v44 = vadd.f32 %v1627_v40, %v373_v37  ;;  %v938_v40 = vrot.slane %v932_v43, 5  ;;  %v1001_v22 = vsel %vm979_vm5, %v998_v9, %v1000_v10  ;;  %v999_v23 = vsel %vm979_vm5, %v997_v11, %v998_v9  ;;  %v1708_v43 = vld [vmem:[%s1394_s20 + $0x8] sm:$0xff]  ;;  %v1731_v11 = vld [vmem:[%s1394_s20 + $0x10] sm:$0x3f]  ;;  %s1264_s20 = sld [smem:[#allocation2 + $0x1c]] }
  0xc6   : > { %v1018_v30 = vrot.slane %v1012_v21, 6  ;;  %v1019_v33 = vrot.slane %v1013_v28, 6  ;;  %v540_v37 = vstv %s1257_s27  ;;  %v1041_v36 = vsel %vm979_vm5, %v1039_v1, %v1040_v32 }
  0xc7   : > { %923 = vrot.lane.b32.xlu1 %v920_v45, %s1359_s29  ;;  %v412_v53 = vadd.f32 %v408_v47, %v394_v44  ;;  %v939_v62 = vsel %vm835_vm4, %v937_v49, %v938_v40  ;;  %v941_v7 = vsel %vm835_vm4, %v938_v40, %v940_v55  ;;  %v1055_v44 = vmul.f32 %v1708_v43, %v1053_v34 }
  0xc8   : > { %921 = vrot.lane.b32.xlu0 %v918_v46, %s1359_s29  ;;  %v1020_v41 = vsel %vm979_vm5, %v1018_v30, %v1019_v33  ;;  %v1056_v45 = vmul.f32 %v1053_v34, %v1422_v16  ;;  %v542_v49 = vmul.f32 %v1708_v43, %v540_v37  ;;  %v543_v50 = vmul.f32 %v540_v37, %v1422_v16 }
  0xc9   : > { %v429_v56 = vpop.permute.xlu1 %428  ;;  %942 = vrot.lane.b32.xlu2 %v939_v62, %s1360_s4  ;;  %v541_v51 = vmul.f32 %v1693_v15, %v540_v37  ;;  %v1042_v40 = vrot.slane %v1035_v42, 6  ;;  %v1060_v55 = vrot.slane %v1054_v48, 6  ;;  %v1074_v62 = vstv %s1283_s30 }
  0xca   : > { %v427_v59 = vpop.permute.xlu0 %426  ;;  %v433_v60 = vadd.f32 %v429_v56, %v412_v53  ;;  %v1063_v53 = vrot.slane %v1056_v45, 6  ;;  %v1075_v58 = vmul.f32 %v1693_v15, %v1074_v62  ;;  %v1076_v10 = vmul.f32 %v1708_v43, %v1074_v62 }
  0xcb   : > { %v432_v61 = vadd.f32 %v427_v59, %v411_v54  ;;  %v1686_v12 = vpop.permute.xlu2 %533  ;;  %v548_v16 = vrot.slane %v541_v51, 3  ;;  %v1043_v3 = vsel %vm979_vm5, %v1040_v32, %v1042_v40  ;;  %v1077_v13 = vmul.f32 %v1731_v11, %v1074_v62 }
  0xcc   : > { %v1081_v17 = vrot.slane %v1075_v58, 6  ;;  %v1098_v30 = vmul.f32 %v1731_v11, %v1095_v57 }
  0xcd   : > { %v453_v4 = vadd.f32 %v1641_v2, %v432_v61  ;;  %v551_v61 = vrot.slane %v543_v50, 3 }
  0xcf   : > { %963 = vrot.lane.b32.xlu1 %v960_v6, %s1361_s5  ;;  %v1096_v6 = vmul.f32 %v1693_v15, %v1095_v57 }
  0xd0   : > { %944 = vrot.lane.b32.xlu0 %v941_v7, %s1360_s4  ;;  %v1097_v7 = vmul.f32 %v1708_v43, %v1095_v57  ;;  %v684_v57 = vstv %s1264_s20 }
  0xd1   : > { %v469_v2 = vpop.permute.xlu1 %468  ;;  %965 = vrot.lane.b32.xlu2 %v962_v20, %s1361_s5 }
  0xd2   : > { %v450_v14 = vpop.permute.xlu0 %449  ;;  %v474_v18 = vadd.f32 %v469_v2, %v453_v4 }
  0xd3   : > { %v454_v19 = vadd.f32 %v450_v14, %v433_v60  ;;  %v1703_v31 = vpop.permute.xlu2 %591  ;;  %v549_v60 = vrot.slane %v542_v49, 3 }
  0xd5   : > { %v475_v26 = vadd.f32 %v1657_v25, %v454_v19  ;;  %v1021_v25 = vrot.slane %v1014_v29, 6  ;;  %v552_v2 = vsel %vm547_vm2, %v549_v60, %v551_v61  ;;  %v550_v14 = vsel %vm547_vm2, %v548_v16, %v549_v60 }
  0xd6   : > { %v687_v16 = vmul.f32 %v1731_v11, %v684_v57 }
  0xd7   : > { %1004 = vrot.lane.b32.xlu1 %v1001_v22, %s1357_s23  ;;  %v1022_v47 = vsel %vm979_vm5, %v1019_v33, %v1021_v25  ;;  %v1082_v22 = vrot.slane %v1076_v10, 6  ;;  %v1105_v25 = vrot.slane %v1098_v30, 6 }
  0xd8   : > { %1002 = vrot.lane.b32.xlu0 %v999_v23, %s1357_s23  ;;  %v1084_v23 = vrot.slane %v1077_v13, 6  ;;  %s1278_s23 = sld [smem:[#allocation2 + $0x2a]] }
  0xd9   : > { %v492_v35 = vpop.permute.xlu1 %491  ;;  %1023 = vrot.lane.b32.xlu2 %v1020_v41, %s1356_s22  ;;  %v1083_v29 = vsel %vm979_vm5, %v1081_v17, %v1082_v22 }
  0xda   : > { %v490_v5 = vpop.permute.xlu0 %489  ;;  %v496_v38 = vadd.f32 %v492_v35, %v475_v26  ;;  %v1085_v33 = vsel %vm979_vm5, %v1082_v22, %v1084_v23 }
  0xdb   : > { %v495_v39 = vadd.f32 %v490_v5, %v474_v18  ;;  %v615_v54 = vpop.permute.xlu2 %614  ;;  %v1103_v18 = vrot.slane %v1097_v7, 6  ;;  %v695_v7 = vrot.slane %v687_v16, 4 }
  0xdd   : > { %v516_v46 = vadd.f32 %v1673_v52, %v495_v39  ;;  %v1061_v52 = vrot.slane %v1055_v44, 6  ;;  %v1106_v39 = vsel %vm979_vm5, %v1103_v18, %v1105_v25 }
  0xdf   : > { %1044 = vrot.lane.b32.xlu1 %v1041_v36, %s1358_s25  ;;  %v1064_v4 = vsel %vm979_vm5, %v1061_v52, %v1063_v53  ;;  %v1062_v9 = vsel %vm979_vm5, %v1060_v55, %v1061_v52 }
  0xe0   : > { %1025 = vrot.lane.b32.xlu0 %v1022_v47, %s1356_s22  ;;  %s1271_s22 = sld [smem:[#allocation2 + $0x23]] }
  0xe1   : > { %v532_v56 = vpop.permute.xlu1 %531  ;;  %1046 = vrot.lane.b32.xlu2 %v1043_v3, %s1358_s25  ;;  %s1285_s25 = sld [smem:[#allocation2 + $0x31]] }
  0xe2   : > { %v513_v59 = vpop.permute.xlu0 %512  ;;  %v537_v63 = vadd.f32 %v532_v56, %v516_v46  ;;  %v685_v56 = vmul.f32 %v1693_v15, %v684_v57 }
  0xe3   : > { %v517_v0 = vadd.f32 %v513_v59, %v496_v38  ;;  %v655_v19 = vpop.permute.xlu2 %654 }
  0xe4   : > { %v555_v21 = vadd.f32 %v550_v14, %v537_v63  ;;  %v692_v63 = vrot.slane %v685_v56, 4 }
  0xe5   : > { %v538_v8 = vadd.f32 %v1686_v12, %v517_v0  ;;  %v1102_v12 = vrot.slane %v1096_v6, 6 }
  0xe6   : > { %v828_v22 = vstv %s1271_s22 }
  0xe7   : > { %1067 = vrot.lane.b32.xlu1 %v1064_v4, %s1359_s29  ;;  %v556_v20 = vadd.f32 %v552_v2, %v538_v8  ;;  %v1104_v32 = vsel %vm979_vm5, %v1102_v12, %v1103_v18 }
  0xe8   : > { %1065 = vrot.lane.b32.xlu0 %v1062_v9, %s1359_s29  ;;  %s1290_s29 = sshll.u32 %s1777_s10, 4 }
  0xe9   : > { %v573_v24 = vpop.permute.xlu1 %572  ;;  %1086 = vrot.lane.b32.xlu2 %v1083_v29, %s1360_s4  ;;  %s157_s3 = scalar_lea.vmem %s1775_s2, %s1290_s29 }
  0xea   : > { %v571_v26 = vpop.permute.xlu0 %570  ;;  %v577_v27 = vadd.f32 %v573_v24, %v556_v20 }
  0xeb   : > { %v576_v28 = vadd.f32 %v571_v26, %v555_v21  ;;  %v678_v34 = vpop.permute.xlu2 %677 }
  0xed   : > { %v597_v1 = vadd.f32 %v1703_v31, %v576_v28  ;;  %v829_v28 = vmul.f32 %v1693_v15, %v828_v22 }
  0xef   : > { %1107 = vrot.lane.b32.xlu1 %v1104_v32, %s1361_s5 }
  0xf0   : > { %1088 = vrot.lane.b32.xlu0 %v1085_v33, %s1360_s4  ;;  %v836_v33 = vrot.slane %v829_v28, 5 }
  0xf1   : > { %v613_v35 = vpop.permute.xlu1 %612  ;;  %1109 = vrot.lane.b32.xlu2 %v1106_v39, %s1361_s5 }
  0xf2   : > { %v594_v5 = vpop.permute.xlu0 %593  ;;  %v618_v37 = vadd.f32 %v613_v35, %v597_v1  ;;  %v831_v1 = vmul.f32 %v1731_v11, %v828_v22 }
  0xf3   : > { %v598_v38 = vadd.f32 %v594_v5, %v577_v27  ;;  %v736_v31 = vpop.permute.xlu2 %735  ;;  %v830_v27 = vmul.f32 %v1708_v43, %v828_v22 }
  0xf5   : > { %v619_v41 = vadd.f32 %v615_v54, %v598_v38  ;;  %v686_v54 = vmul.f32 %v1708_v43, %v684_v57  ;;  %v837_v32 = vrot.slane %v830_v27, 5  ;;  %v1116_v27 = vstv %s1285_s25 }
  0xf7   : > { %v693_v62 = vrot.slane %v686_v54, 4 }
  0xf9   : > { %v636_v42 = vpop.permute.xlu1 %635  ;;  %v694_v8 = vsel %vm691_vm3, %v692_v63, %v693_v62  ;;  %v696_v14 = vsel %vm691_vm3, %v693_v62, %v695_v7 }
  0xfa   : > { %v634_v44 = vpop.permute.xlu0 %633  ;;  %v640_v0 = vadd.f32 %v636_v42, %v619_v41  ;;  %v839_v41 = vrot.slane %v831_v1, 5 }
  0xfb   : > { %v759_v45 = vpop.permute.xlu2 %758  ;;  %v639_v59 = vadd.f32 %v634_v44, %v618_v37 }
  0xfd   : > { %v660_v3 = vadd.f32 %v655_v19, %v639_v59 }
 0x101   : > { %v676_v46 = vpop.permute.xlu1 %675 }
 0x102   : > { %v657_v36 = vpop.permute.xlu0 %656  ;;  %v681_v4 = vadd.f32 %v676_v46, %v660_v3  ;;  %v840_v46 = vsel %vm835_vm4, %v837_v32, %v839_v41 }
 0x103   : > { %v799_v47 = vpop.permute.xlu2 %798  ;;  %v661_v6 = vadd.f32 %v657_v36, %v640_v0 }
 0x104   : > { %v699_v2 = vadd.f32 %v694_v8, %v681_v4 }
 0x105   : > { %v682_v13 = vadd.f32 %v678_v34, %v661_v6 }
 0x107   : > { %v700_v12 = vadd.f32 %v696_v14, %v682_v13 }
 0x109   : > { %v717_v48 = vpop.permute.xlu1 %716 }
 0x10a   : > { %v715_v49 = vpop.permute.xlu0 %714  ;;  %v721_v20 = vadd.f32 %v717_v48, %v700_v12 }
 0x10b   : > { %v822_v50 = vpop.permute.xlu2 %821  ;;  %v720_v17 = vadd.f32 %v715_v49, %v699_v2 }
 0x10d   : > { %v741_v21 = vadd.f32 %v736_v31, %v720_v17  ;;  %v838_v31 = vsel %vm835_vm4, %v836_v33, %v837_v32 }
 0x111   : > { %v757_v51 = vpop.permute.xlu1 %756 }
 0x112   : > { %v738_v40 = vpop.permute.xlu0 %737  ;;  %v762_v24 = vadd.f32 %v757_v51, %v741_v21 }
 0x113   : > { %v880_v55 = vpop.permute.xlu2 %879  ;;  %v742_v26 = vadd.f32 %v738_v40, %v721_v20 }
 0x115   : > { %v763_v30 = vadd.f32 %v759_v45, %v742_v26 }
 0x119   : > { %v780_v52 = vpop.permute.xlu1 %779 }
 0x11a   : > { %v778_v53 = vpop.permute.xlu0 %777  ;;  %v784_v25 = vadd.f32 %v780_v52, %v763_v30  ;;  %v972_v52 = vstv %s1278_s23 }
 0x11b   : > { %v903_v58 = vpop.permute.xlu2 %902  ;;  %v783_v29 = vadd.f32 %v778_v53, %v762_v24  ;;  %v974_v54 = vmul.f32 %v1708_v43, %v972_v52  ;;  %v973_v56 = vmul.f32 %v1693_v15, %v972_v52  ;;  %v975_v16 = vmul.f32 %v1731_v11, %v972_v52 }
 0x11d   : > { %v804_v34 = vadd.f32 %v799_v47, %v783_v29  ;;  %v981_v62 = vrot.slane %v974_v54, 6  ;;  %v980_v63 = vrot.slane %v973_v56, 6  ;;  %v983_v7 = vrot.slane %v975_v16, 6 }
 0x11f   : > { %v982_v8 = vsel %vm979_vm5, %v980_v63, %v981_v62  ;;  %v984_v13 = vsel %vm979_vm5, %v981_v62, %v983_v7 }
 0x121   : > { %v820_v60 = vpop.permute.xlu1 %819 }
 0x122   : > { %v801_v61 = vpop.permute.xlu0 %800  ;;  %v825_v38 = vadd.f32 %v820_v60, %v804_v34 }
 0x123   : > { %v943_v18 = vpop.permute.xlu2 %942  ;;  %v805_v39 = vadd.f32 %v801_v61, %v784_v25 }
 0x124   : > { %v843_v44 = vadd.f32 %v838_v31, %v825_v38 }
 0x125   : > { %v826_v42 = vadd.f32 %v822_v50, %v805_v39 }
 0x127   : > { %v844_v49 = vadd.f32 %v840_v46, %v826_v42 }
 0x129   : > { %v861_v9 = vpop.permute.xlu1 %860 }
 0x12a   : > { %v859_v10 = vpop.permute.xlu0 %858  ;;  %v865_v40 = vadd.f32 %v861_v9, %v844_v49 }
 0x12b   : > { %v966_v35 = vpop.permute.xlu2 %965  ;;  %v864_v45 = vadd.f32 %v859_v10, %v843_v44 }
 0x12d   : > { %v885_v47 = vadd.f32 %v880_v55, %v864_v45 }
 0x131   : > { %v901_v19 = vpop.permute.xlu1 %900 }
 0x132   : > { %v882_v23 = vpop.permute.xlu0 %881  ;;  %v906_v53 = vadd.f32 %v901_v19, %v885_v47 }
 0x133   : > { %v1024_v51 = vpop.permute.xlu2 %1023  ;;  %v886_v57 = vadd.f32 %v882_v23, %v865_v40 }
 0x135   : > { %v907_v61 = vadd.f32 %v903_v58, %v886_v57 }
 0x139   : > { %v924_v5 = vpop.permute.xlu1 %923 }
 0x13a   : > { %v922_v37 = vpop.permute.xlu0 %921  ;;  %v928_v0 = vadd.f32 %v924_v5, %v907_v61 }
 0x13b   : > { %v927_v59 = vadd.f32 %v922_v37, %v906_v53  ;;  %v1047_v4 = vpop.permute.xlu2 %1046 }
 0x13d   : > { %v948_v3 = vadd.f32 %v943_v18, %v927_v59 }
 0x141   : > { %v964_v36 = vpop.permute.xlu1 %963 }
 0x142   : > { %v945_v48 = vpop.permute.xlu0 %944  ;;  %v969_v6 = vadd.f32 %v964_v36, %v948_v3 }
 0x143   : > { %v949_v55 = vadd.f32 %v945_v48, %v928_v0  ;;  %v1087_v14 = vpop.permute.xlu2 %1086 }
 0x144   : > { %v987_v15 = vadd.f32 %v982_v8, %v969_v6 }
 0x145   : > { %v970_v10 = vadd.f32 %v966_v35, %v949_v55 }
 0x147   : > { %v988_v58 = vadd.f32 %v984_v13, %v970_v10 }
 0x149   : > { %v1005_v60 = vpop.permute.xlu1 %1004 }
 0x14a   : > { %v1003_v50 = vpop.permute.xlu0 %1002  ;;  %v1009_v11 = vadd.f32 %v1005_v60, %v988_v58 }
 0x14b   : > { %v1008_v2 = vadd.f32 %v1003_v50, %v987_v15  ;;  %v1110_v26 = vpop.permute.xlu2 %1109 }
 0x14d   : > { %v1029_v17 = vadd.f32 %v1024_v51, %v1008_v2 }
 0x151   : > { %v1045_v9 = vpop.permute.xlu1 %1044 }
 0x152   : > { %v1026_v43 = vpop.permute.xlu0 %1025  ;;  %v1050_v18 = vadd.f32 %v1045_v9, %v1029_v17 }
 0x153   : > { %v1030_v21 = vadd.f32 %v1026_v43, %v1009_v11 }
 0x155   : > { %v1051_v19 = vadd.f32 %v1047_v4, %v1030_v21 }
 0x159   : > { %v1068_v12 = vpop.permute.xlu1 %1067 }
 0x15a   : > { %v1066_v20 = vpop.permute.xlu0 %1065  ;;  %v1072_v23 = vadd.f32 %v1068_v12, %v1051_v19 }
 0x15b   : > { %v1071_v22 = vadd.f32 %v1066_v20, %v1050_v18 }
 0x15d   : > { %v1092_v24 = vadd.f32 %v1087_v14, %v1071_v22 }
 0x161   : > { %v1108_v28 = vpop.permute.xlu1 %1107 }
 0x162   : > { %v1089_v29 = vpop.permute.xlu0 %1088  ;;  %v1113_v30 = vadd.f32 %v1108_v28, %v1092_v24 }
 0x163   : > { %v1093_v1 = vadd.f32 %v1089_v29, %v1072_v23 }
 0x164   : > { %v1117_v32 = vadd.f32 %v1116_v27, %v1113_v30 }
 0x165   : > { %v1114_v33 = vadd.f32 %v1110_v26, %v1093_v1 }
 0x166   : > { %v1286_v25 = vmul.f32 -1.442695, %v1117_v32 }
 0x167   : > { %v1118_v34 = vadd.f32 %v1116_v27, %v1114_v33 }
 0x168   : > { %1317 = vpow2.f32 %v1286_v25 }
 0x169   : > { %v1287_v35 = vmul.f32 -1.442695, %v1118_v34 }
 0x16b   : > { %1319 = vpow2.f32 %v1287_v35 }
 0x16e   : > { %v1318_v5 = vpop.eup %1317 }
 0x16f   : > { %v1125_v37 = vadd.f32 1.0, %v1318_v5 }
 0x171   : > { %v1320_v38 = vpop.eup %1319  ;;  %1321 = vrcp.f32 %v1125_v37  ;;  %v1138_v46 = vand.u32 2147483648, %v1125_v37  ;;  %v1136_v48 = vand.u32 2147483647, %v1125_v37  ;;  %vm1132_vm8 = vweird.f32 %v1125_v37 }
 0x172   : > { %v1126_v39 = vadd.f32 1.0, %v1320_v38 }
 0x173   : > { %v1139_v47 = vor.u32 1.1754944e-38, %v1138_v46  ;;  %vm1137_vm11 = vcmp.eq.f32.partialorder %v1136_v48, 8.507059e+37 }
 0x174   : > { %1323 = vrcp.f32 %v1126_v39  ;;  %v1153_v40 = vand.u32 2147483648, %v1126_v39  ;;  %v1151_v53 = vand.u32 2147483647, %v1126_v39  ;;  %vm1147_vm12 = vweird.f32 %v1126_v39 }
 0x176   : > { %v1154_v59 = vor.u32 1.1754944e-38, %v1153_v40  ;;  %vm1152_vm14 = vcmp.eq.f32.partialorder %v1151_v53, 8.507059e+37 }
 0x177   : > { %v1322_v41 = vpop.eup %1321 }
 0x178   : > { %v1128_v31 = vmul.f32 %v1322_v41, %v1125_v37  ;;  %vm1133_vm6 = vweird.f32 %v1322_v41 }
 0x179   : > { %vm1134_vm9 = vmor %vm1132_vm8, %vm1133_vm6 }
 0x17a   : > { %v1324_v42 = vpop.eup %1323  ;;  %v1129_v44 = vsub.f32 1.0, %v1128_v31 }
 0x17b   : > { %v1143_v45 = vmul.f32 %v1324_v42, %v1126_v39  ;;  %vm1148_vm10 = vweird.f32 %v1324_v42 }
 0x17c   : > { %v1130_v36 = vmul.f32 %v1322_v41, %v1129_v44  ;;  %vm1149_vm13 = vmor %vm1147_vm12, %vm1148_vm10 }
 0x17d   : > { %v1144_v49 = vsub.f32 1.0, %v1143_v45 }
 0x17e   : > { %v1131_v51 = vadd.f32 %v1322_v41, %v1130_v36 }
 0x17f   : > { %v1145_v52 = vmul.f32 %v1324_v42, %v1144_v49 }
 0x180   : > { %v1135_v57 = vsel %vm1134_vm9, %v1322_v41, %v1131_v51 }
 0x181   : > { %v1140_v54 = vsel %vm1137_vm11, %v1139_v47, %v1135_v57  ;;  %v1146_v56 = vadd.f32 %v1324_v42, %v1145_v52 }
 0x182   : > { %1158 = vst.msk [vmem:[%s157_s3] sm:$0xff] %vm1157_vm7, %v1140_v54 }
 0x183   : > { %v1150_v60 = vsel %vm1149_vm13, %v1324_v42, %v1146_v56 }
 0x184   : > { %v1155_v50 = vsel %vm1152_vm14, %v1154_v59, %v1150_v60 }
 0x185   : > { %1159 = vst.msk [vmem:[%s157_s3 + $0x8] sm:$0xff] %vm1157_vm7, %v1155_v50 }
 0x186 PF: > { %s13_s9 = sadd.s32 1, %s1353_s9  }
 0x187   : > { %p10_p7 = scmp.ge.s32.totalorder %s13_s9, 4  }
 0x189   :  { %12 = sbr.rel (!%p10_p7) target bundleno = 1 (0x1), region = 63 }
 0x18e   :  { %1181 = vsyncpa [#allocation3], 1 }
 0x18f   :  { %1183 = vsyncpa [#allocation3 + $0x1], 1 }

</bundles_post_ra>
